<compile_context>
chip_gen: v5e
topology: v5e:2x2
jax: 0.10.0
libtpu: 0.0.40
codegen_flags: <defaults>
</compile_context>

<pallas_src>
import functools

import jax
import jax.numpy as jnp
from jax import lax
from jax.experimental import pallas as pl
from jax.experimental.pallas import tpu as pltpu

EPS = 1e-5
K = 3        # 3x3 depthwise kernel (stride=1, padding=1, MobileNetV1 block)
LANES = 128  # TPU lane width


# ----------------------------------------------------------------------------
# Fused kernel: one (batch, row-strip) grid step.
# ----------------------------------------------------------------------------
def _fused_dsconv_kernel(x_mid_ref, x_top_ref, x_bot_ref, dw_taps_ref,
                         dw_scale_ref, dw_bias_ref, pw_w_ref, pw_b_ref,
                         o_ref, *, n_cout_tiles, cout_tile):
    i = pl.program_id(1)
    n_strips = pl.num_programs(1)
    TH, Wp, C = x_mid_ref.shape          # Wp == W + 2 (wrapper-padded width)
    W = Wp - 2
    f32 = jnp.float32

    # ---- vertically padded strip as a VALUE (no scratch round trip) --------
    mid = x_mid_ref[...].astype(f32)                               # (TH,  Wp, C)
    top = jnp.where(i > 0, x_top_ref[...].astype(f32), 0.0)        # (1,   Wp, C)
    bot = jnp.where(i < n_strips - 1, x_bot_ref[...].astype(f32), 0.0)
    strip = jnp.concatenate([top, mid, bot], axis=0)               # (TH+2, Wp, C)

    # ---- depthwise 3x3: one slice per kw (kw=0 aligned; kw=1,2 are the only
    #      sublane relayouts), vertical taps are free leading-axis slices ----
    taps = dw_taps_ref[...]                                        # (9, 1, C) f32
    acc = jnp.zeros((TH, W, C), f32)
    for kw in range(K):
        v = strip[:, kw:kw + W, :]                                 # (TH+2, W, C)
        for kh in range(K):
            acc = acc + v[kh:kh + TH] * taps[K * kh + kw]
    # TODO(synk): on v6e/v7x the tap math could run in packed bf16 (2x VALU);
    # kept f32 so the same kernel stays safe/optimal on v5e (no bf16 VALU).

    # folded BatchNorm + ReLU (depthwise stage); never leaves VMEM.
    y = jnp.maximum(acc * dw_scale_ref[...] + dw_bias_ref[...], 0.0)

    # ---- pointwise 1x1 conv: (TH*W, C) x (C, C_out) MXU matmul, tiled over
    #      C_out; lane-dense, unmasked output stores ---------------------------
    y2 = y.reshape(TH * W, C).astype(pw_w_ref.dtype)
    for t in range(n_cout_tiles):
        lo = t * cout_tile
        hi = lo + cout_tile
        z = jnp.dot(y2, pw_w_ref[:, lo:hi], preferred_element_type=jnp.float32)
        z = jnp.maximum(z + pw_b_ref[:, lo:hi], 0.0)               # folded BN + ReLU
        o_ref[:, lo:hi] = z.astype(o_ref.dtype)


# ----------------------------------------------------------------------------
# Device-aware VMEM planning
# ----------------------------------------------------------------------------
def _round_up(x, m):
    return (x + m - 1) // m * m


def _vmem_capacity_bytes():
    try:
        return int(pltpu.get_tpu_info().vmem_capacity_bytes)
    except Exception:
        return 64 * 1024 * 1024  # conservative fallback (v7x per-TC VMEM)


def _pick_strip_rows(H, W, C_pad, C_out_pad, act_bytes, cout_tile, budget,
                     target_rows=1024):
    """Largest-useful strip height TH (divisor of H) that fits the VMEM budget."""
    Wp = W + 2
    cands = [d for d in range(1, H + 1)
             if H % d == 0 and ((d * W) % 8 == 0 or d == H)]

    def need(th):
        m = th * W
        # double-buffered pipeline blocks (activation dtype)
        io = 2 * act_bytes * (th * Wp * C_pad + 2 * Wp * C_pad + m * C_out_pad)
        # resident weights / folded-BN params
        wts = 4 * (K * K * C_pad + 2 * C_pad + C_out_pad) \
            + act_bytes * C_pad * C_out_pad
        # in-kernel f32 values: cast mid + strip + 2 shifted views, acc + y +
        # y2, one (m, cout_tile) matmul result tile
        vals = 4 * ((th + 2) * Wp * C_pad * 4 + m * C_pad * 3 + m * cout_tile)
        return io + wts + vals

    fitting = [t for t in cands if need(t) <= budget]
    if not fitting:
        # TODO(synk): also tile along W / C for huge rows; fall back to the
        # smallest strip and rely on the vmem_limit headroom.
        return cands[0]
    for t in fitting:                      # smallest strip hitting the target M
        if t * W >= target_rows:
            return t
    return fitting[-1]                     # else the largest strip that fits


# ----------------------------------------------------------------------------
# NHWC entry point (preferred when chaining layers)
# ----------------------------------------------------------------------------
def depthwise_separable_conv2d_nhwc(x, params):
    """x: (N, H, W, C) float32 or bfloat16 -> (N, H, W, C_out) in x.dtype."""
    (dw_w, g1, b1, m1, v1, pw_w, pw_b, g2, b2, m2, v2) = params
    N, H, W, C = x.shape
    C_out = pw_w.shape[0]
    act_dtype = x.dtype

    # lane-dense channel padding (padded channels stay exactly zero end-to-end)
    C_pad = _round_up(C, LANES)
    C_out_pad = _round_up(C_out, LANES)

    # ---- fold BatchNorm (eval mode) into per-channel scale / bias -----------
    s1 = (g1 / jnp.sqrt(v1 + EPS)).astype(jnp.float32)
    dw_scale = jnp.zeros((1, C_pad), jnp.float32).at[0, :C].set(s1)
    dw_bias = jnp.zeros((1, C_pad), jnp.float32).at[0, :C].set(
        b1.astype(jnp.float32) - m1 * s1)
    taps = jnp.transpose(dw_w[:, 0, :, :].astype(jnp.float32), (1, 2, 0))  # (K,K,C)
    dw_taps = jnp.zeros((K, K, C_pad), jnp.float32).at[:, :, :C].set(taps)
    dw_taps = dw_taps.reshape(K * K, 1, C_pad)

    s2 = (g2 / jnp.sqrt(v2 + EPS)).astype(jnp.float32)
    pw_w_f = (jnp.transpose(pw_w[:, :, 0, 0], (1, 0)).astype(jnp.float32)
              * s2[None, :])                                         # (C, C_out)
    pw_w_eff = (jnp.zeros((C_pad, C_out_pad), jnp.float32)
                .at[:C, :C_out].set(pw_w_f).astype(act_dtype))
    pw_b_eff = jnp.zeros((1, C_out_pad), jnp.float32).at[0, :C_out].set(
        (pw_b.astype(jnp.float32) - m2) * s2 + b2)

    # horizontal zero pad (padding=1) + channel pad done once in the wrapper,
    # so every in-kernel access is a full aligned slab.
    x_p = jnp.pad(x, ((0, 0), (0, 0), (1, 1), (0, C_pad - C)))

    act_bytes = jnp.dtype(act_dtype).itemsize
    cout_tile = 256 if C_out_pad % 256 == 0 else 128
    n_ct = C_out_pad // cout_tile

    phys = _vmem_capacity_bytes()
    vmem_limit = max(32 << 20, min(phys // 2, 64 << 20))
    budget = vmem_limit // 2              # 2x headroom for compiler temporaries

    TH = _pick_strip_rows(H, W, C_pad, C_out_pad, act_bytes, cout_tile, budget)
    n_strips = H // TH

    kernel = functools.partial(_fused_dsconv_kernel,
                               n_cout_tiles=n_ct, cout_tile=cout_tile)

    out = pl.pallas_call(
        kernel,
        out_shape=jax.ShapeDtypeStruct((N, H * W, C_out_pad), act_dtype),
        grid_spec=pltpu.PrefetchScalarGridSpec(
            num_scalar_prefetch=0,
            grid=(N, n_strips),
            in_specs=[
                # main row strip (aligned (W+2, C_pad) slabs)
                pl.BlockSpec((None, TH, W + 2, C_pad), lambda n, i: (n, i, 0, 0)),
                # 1-row top / bottom halos (clamped; masked in-kernel at edges)
                pl.BlockSpec((None, 1, W + 2, C_pad),
                             lambda n, i: (n, jnp.maximum(i * TH - 1, 0), 0, 0)),
                pl.BlockSpec((None, 1, W + 2, C_pad),
                             lambda n, i: (n, jnp.minimum((i + 1) * TH, H - 1), 0, 0)),
                # weights / folded BN params: resident (constant index_map)
                pl.BlockSpec((K * K, 1, C_pad), lambda n, i: (0, 0, 0)),
                pl.BlockSpec((1, C_pad), lambda n, i: (0, 0)),
                pl.BlockSpec((1, C_pad), lambda n, i: (0, 0)),
                pl.BlockSpec((C_pad, C_out_pad), lambda n, i: (0, 0)),
                pl.BlockSpec((1, C_out_pad), lambda n, i: (0, 0)),
            ],
            out_specs=pl.BlockSpec((None, TH * W, C_out_pad),
                                   lambda n, i: (n, i, 0)),
        ),
        compiler_params=pltpu.CompilerParams(
            dimension_semantics=("parallel", "parallel"),
            vmem_limit_bytes=int(vmem_limit),
        ),
    )(x_p, x_p, x_p, dw_taps, dw_scale, dw_bias, pw_w_eff, pw_b_eff)

    return out[:, :, :C_out].reshape(N, H, W, C_out)


# ----------------------------------------------------------------------------
# PyTorch-layout entry point (NCHW in / NCHW out), matches the nn.Module
# ----------------------------------------------------------------------------
@jax.jit
def depth_separable_conv2d(x_nchw, params):
    # NOTE: when stacking MobileNet blocks, keep activations NHWC and call
    # depthwise_separable_conv2d_nhwc directly to avoid these relayouts.
    x = jnp.transpose(x_nchw, (0, 2, 3, 1))
    y = depthwise_separable_conv2d_nhwc(x, params)
    return jnp.transpose(y, (0, 3, 1, 2))


# ----------------------------------------------------------------------------
# Pure-JAX reference (mirrors the PyTorch forward, eval-mode BatchNorm)
# ----------------------------------------------------------------------------
def _reference(x, params):
    (dw_w, g1, b1, m1, v1, pw_w, pw_b, g2, b2, m2, v2) = params
    C = x.shape[1]
    dn = ('NCHW', 'OIHW', 'NCHW')
    y = lax.conv_general_dilated(x, dw_w, (1, 1), ((1, 1), (1, 1)),
                                 dimension_numbers=dn, feature_group_count=C)
    y = (y - m1[None, :, None, None]) / jnp.sqrt(v1[None, :, None, None] + EPS)
    y = y * g1[None, :, None, None] + b1[None, :, None, None]
    y = jnp.maximum(y, 0.0)
    z = lax.conv_general_dilated(y, pw_w, (1, 1), ((0, 0), (0, 0)),
                                 dimension_numbers=dn)
    z = z + pw_b[None, :, None, None]
    z = (z - m2[None, :, None, None]) / jnp.sqrt(v2[None, :, None, None] + EPS)
    z = z * g2[None, :, None, None] + b2[None, :, None, None]
    return jnp.maximum(z, 0.0)


if __name__ == "__main__":
    N, C_in, C_out, H, W = 2, 4, 8, 16, 16

    key = jax.random.PRNGKey(0)
    ks = jax.random.split(key, 13)

    # Deterministic synthetic parameters (PyTorch tensor layouts).
    dw_w = jax.random.normal(ks[0], (C_in, 1, K, K), jnp.float32) * 0.2
    g1 = 1.0 + 0.1 * jax.random.normal(ks[1], (C_in,), jnp.float32)
    b1 = 0.1 * jax.random.normal(ks[2], (C_in,), jnp.float32)
    m1 = 0.1 * jax.random.normal(ks[3], (C_in,), jnp.float32)
    v1 = jnp.abs(jax.random.normal(ks[4], (C_in,), jnp.float32)) + 0.5
    pw_w = jax.random.normal(ks[5], (C_out, C_in, 1, 1), jnp.float32) * 0.2
    pw_b = 0.1 * jax.random.normal(ks[6], (C_out,), jnp.float32)
    g2 = 1.0 + 0.1 * jax.random.normal(ks[7], (C_out,), jnp.float32)
    b2 = 0.1 * jax.random.normal(ks[8], (C_out,), jnp.float32)
    m2 = 0.1 * jax.random.normal(ks[9], (C_out,), jnp.float32)
    v2 = jnp.abs(jax.random.normal(ks[10], (C_out,), jnp.float32)) + 0.5
    params = (dw_w, g1, b1, m1, v1, pw_w, pw_b, g2, b2, m2, v2)

    x = jax.random.normal(ks[11], (N, C_in, H, W), jnp.float32)

    # f32 path: strict check against the pure-JAX reference.
    out = jax.block_until_ready(depth_separable_conv2d(x, params))
    ref = jax.block_until_ready(_reference(x, params))
    assert out.shape == (N, C_out, H, W)
    assert jnp.allclose(out, ref, rtol=1e-4, atol=1e-4), "f32 mismatch vs reference"

    # bf16 activation storage (halves HBM traffic); f32 accumulation.
    x_bf16 = x.astype(jnp.bfloat16)
    out_bf16 = jax.block_until_ready(depth_separable_conv2d(x_bf16, params))
    ref_bf16 = _reference(x_bf16.astype(jnp.float32), params)
    assert out_bf16.shape == (N, C_out, H, W)
    assert jnp.allclose(out_bf16.astype(jnp.float32), ref_bf16,
                        rtol=5e-2, atol=5e-2), "bf16 mismatch vs reference"

    # Taller image: exercises the multi-strip grid path (cross-strip halos).
    x_tall = jax.random.normal(ks[12], (1, C_in, 128, W), jnp.float32)
    out_t = jax.block_until_ready(depth_separable_conv2d(x_tall, params))
    ref_t = jax.block_until_ready(_reference(x_tall, params))
    assert out_t.shape == (1, C_out, 128, W)
    assert jnp.allclose(out_t, ref_t, rtol=1e-4, atol=1e-4), "multi-strip mismatch"

    print("KERNEL_OK")
</pallas_src>

<mosaic_0001>
module attributes {stable_mosaic.version = 11 : i64} {
  func.func @_fused_dsconv_kernel(%arg0: i32, %arg1: i32, %arg2: memref<1x16x18x128xf32, #tpu.memory_space<vmem>>, %arg3: memref<1x1x18x128xf32, #tpu.memory_space<vmem>>, %arg4: memref<1x1x18x128xf32, #tpu.memory_space<vmem>>, %arg5: memref<9x1x128xf32, #tpu.memory_space<vmem>>, %arg6: memref<1x128xf32, #tpu.memory_space<vmem>>, %arg7: memref<1x128xf32, #tpu.memory_space<vmem>>, %arg8: memref<128x128xf32, #tpu.memory_space<vmem>>, %arg9: memref<1x128xf32, #tpu.memory_space<vmem>>, %arg10: memref<1x256x128xf32, #tpu.memory_space<vmem>>) attributes {dimension_semantics = [#tpu.dimension_semantics<parallel>, #tpu.dimension_semantics<parallel>], iteration_bounds = array<i64: 2, 1>, scalar_prefetch = 0 : i64, scratch_operands = 0 : i64, tpu.core_type = #tpu.core_type<tc>, window_params = [{transform_indices = @transform_0, window_bounds = array<i64: 1, 16, 18, 128>}, {transform_indices = @transform_1, window_bounds = array<i64: 1, 1, 18, 128>}, {transform_indices = @transform_2, window_bounds = array<i64: 1, 1, 18, 128>}, {pipeline_mode = #tpu.pipeline_mode<synchronous>, transform_indices = @transform_3, window_bounds = array<i64: 9, 1, 128>}, {pipeline_mode = #tpu.pipeline_mode<synchronous>, transform_indices = @transform_4, window_bounds = array<i64: 1, 128>}, {pipeline_mode = #tpu.pipeline_mode<synchronous>, transform_indices = @transform_5, window_bounds = array<i64: 1, 128>}, {pipeline_mode = #tpu.pipeline_mode<synchronous>, transform_indices = @transform_6, window_bounds = array<i64: 128, 128>}, {pipeline_mode = #tpu.pipeline_mode<synchronous>, transform_indices = @transform_7, window_bounds = array<i64: 1, 128>}, {transform_indices = @transform_8, window_bounds = array<i64: 1, 256, 128>}]} {
    %c0 = arith.constant 0 : index
    %c0_0 = arith.constant 0 : index
    %c0_1 = arith.constant 0 : index
    %c0_2 = arith.constant 0 : index
    %0 = vector.load %arg2[%c0, %c0_0, %c0_1, %c0_2] : memref<1x16x18x128xf32, #tpu.memory_space<vmem>>, vector<1x16x18x128xf32>
    %1 = vector.shape_cast %0 : vector<1x16x18x128xf32> to vector<16x18x128xf32>
    %c0_i32 = arith.constant 0 : i32
    %2 = arith.cmpi sgt, %arg1, %c0_i32 : i32
    %c0_3 = arith.constant 0 : index
    %c0_4 = arith.constant 0 : index
    %c0_5 = arith.constant 0 : index
    %c0_6 = arith.constant 0 : index
    %3 = vector.load %arg3[%c0_3, %c0_4, %c0_5, %c0_6] : memref<1x1x18x128xf32, #tpu.memory_space<vmem>>, vector<1x1x18x128xf32>
    %4 = vector.shape_cast %3 : vector<1x1x18x128xf32> to vector<1x18x128xf32>
    %cst = arith.constant 0.000000e+00 : f32
    %5 = vector.broadcast %cst : f32 to vector<1x18x128xf32>
    %6 = arith.select %2, %4, %5 : vector<1x18x128xf32>
    %c0_i32_7 = arith.constant 0 : i32
    %7 = arith.cmpi slt, %arg1, %c0_i32_7 : i32
    %c0_8 = arith.constant 0 : index
    %c0_9 = arith.constant 0 : index
    %c0_10 = arith.constant 0 : index
    %c0_11 = arith.constant 0 : index
    %8 = vector.load %arg4[%c0_8, %c0_9, %c0_10, %c0_11] : memref<1x1x18x128xf32, #tpu.memory_space<vmem>>, vector<1x1x18x128xf32>
    %9 = vector.shape_cast %8 : vector<1x1x18x128xf32> to vector<1x18x128xf32>
    %cst_12 = arith.constant 0.000000e+00 : f32
    %10 = vector.broadcast %cst_12 : f32 to vector<1x18x128xf32>
    %11 = arith.select %7, %9, %10 : vector<1x18x128xf32>
    %12 = tpu.concatenate %6, %1, %11 in 0 : vector<1x18x128xf32>, vector<16x18x128xf32>, vector<1x18x128xf32> -> vector<18x18x128xf32>
    %c0_13 = arith.constant 0 : index
    %c0_14 = arith.constant 0 : index
    %c0_15 = arith.constant 0 : index
    %13 = vector.load %arg5[%c0_13, %c0_14, %c0_15] : memref<9x1x128xf32, #tpu.memory_space<vmem>>, vector<9x1x128xf32>
    %cst_16 = arith.constant 0.000000e+00 : f32
    %14 = vector.broadcast %cst_16 : f32 to vector<16x16x128xf32>
    %15 = vector.extract_strided_slice %12 {offsets = [0, 0, 0], sizes = [18, 16, 128], strides = [1, 1, 1]} : vector<18x18x128xf32> to vector<18x16x128xf32>
    %16 = vector.extract_strided_slice %15 {offsets = [0, 0, 0], sizes = [16, 16, 128], strides = [1, 1, 1]} : vector<18x16x128xf32> to vector<16x16x128xf32>
    %17 = vector.extract_strided_slice %13 {offsets = [0, 0, 0], sizes = [1, 1, 128], strides = [1, 1, 1]} : vector<9x1x128xf32> to vector<1x1x128xf32>
    %18 = vector.shape_cast %17 : vector<1x1x128xf32> to vector<1x128xf32>
    %19 = vector.shape_cast %18 : vector<1x128xf32> to vector<1x1x128xf32>
    %20 = vector.broadcast %19 : vector<1x1x128xf32> to vector<16x16x128xf32>
    %21 = arith.mulf %16, %20 : vector<16x16x128xf32>
    %22 = arith.addf %14, %21 : vector<16x16x128xf32>
    %23 = vector.extract_strided_slice %15 {offsets = [1, 0, 0], sizes = [16, 16, 128], strides = [1, 1, 1]} : vector<18x16x128xf32> to vector<16x16x128xf32>
    %24 = vector.extract_strided_slice %13 {offsets = [3, 0, 0], sizes = [1, 1, 128], strides = [1, 1, 1]} : vector<9x1x128xf32> to vector<1x1x128xf32>
    %25 = vector.shape_cast %24 : vector<1x1x128xf32> to vector<1x128xf32>
    %26 = vector.shape_cast %25 : vector<1x128xf32> to vector<1x1x128xf32>
    %27 = vector.broadcast %26 : vector<1x1x128xf32> to vector<16x16x128xf32>
    %28 = arith.mulf %23, %27 : vector<16x16x128xf32>
    %29 = arith.addf %22, %28 : vector<16x16x128xf32>
    %30 = vector.extract_strided_slice %15 {offsets = [2, 0, 0], sizes = [16, 16, 128], strides = [1, 1, 1]} : vector<18x16x128xf32> to vector<16x16x128xf32>
    %31 = vector.extract_strided_slice %13 {offsets = [6, 0, 0], sizes = [1, 1, 128], strides = [1, 1, 1]} : vector<9x1x128xf32> to vector<1x1x128xf32>
    %32 = vector.shape_cast %31 : vector<1x1x128xf32> to vector<1x128xf32>
    %33 = vector.shape_cast %32 : vector<1x128xf32> to vector<1x1x128xf32>
    %34 = vector.broadcast %33 : vector<1x1x128xf32> to vector<16x16x128xf32>
    %35 = arith.mulf %30, %34 : vector<16x16x128xf32>
    %36 = arith.addf %29, %35 : vector<16x16x128xf32>
    %37 = vector.extract_strided_slice %12 {offsets = [0, 1, 0], sizes = [18, 16, 128], strides = [1, 1, 1]} : vector<18x18x128xf32> to vector<18x16x128xf32>
    %38 = vector.extract_strided_slice %37 {offsets = [0, 0, 0], sizes = [16, 16, 128], strides = [1, 1, 1]} : vector<18x16x128xf32> to vector<16x16x128xf32>
    %39 = vector.extract_strided_slice %13 {offsets = [1, 0, 0], sizes = [1, 1, 128], strides = [1, 1, 1]} : vector<9x1x128xf32> to vector<1x1x128xf32>
    %40 = vector.shape_cast %39 : vector<1x1x128xf32> to vector<1x128xf32>
    %41 = vector.shape_cast %40 : vector<1x128xf32> to vector<1x1x128xf32>
    %42 = vector.broadcast %41 : vector<1x1x128xf32> to vector<16x16x128xf32>
    %43 = arith.mulf %38, %42 : vector<16x16x128xf32>
    %44 = arith.addf %36, %43 : vector<16x16x128xf32>
    %45 = vector.extract_strided_slice %37 {offsets = [1, 0, 0], sizes = [16, 16, 128], strides = [1, 1, 1]} : vector<18x16x128xf32> to vector<16x16x128xf32>
    %46 = vector.extract_strided_slice %13 {offsets = [4, 0, 0], sizes = [1, 1, 128], strides = [1, 1, 1]} : vector<9x1x128xf32> to vector<1x1x128xf32>
    %47 = vector.shape_cast %46 : vector<1x1x128xf32> to vector<1x128xf32>
    %48 = vector.shape_cast %47 : vector<1x128xf32> to vector<1x1x128xf32>
    %49 = vector.broadcast %48 : vector<1x1x128xf32> to vector<16x16x128xf32>
    %50 = arith.mulf %45, %49 : vector<16x16x128xf32>
    %51 = arith.addf %44, %50 : vector<16x16x128xf32>
    %52 = vector.extract_strided_slice %37 {offsets = [2, 0, 0], sizes = [16, 16, 128], strides = [1, 1, 1]} : vector<18x16x128xf32> to vector<16x16x128xf32>
    %53 = vector.extract_strided_slice %13 {offsets = [7, 0, 0], sizes = [1, 1, 128], strides = [1, 1, 1]} : vector<9x1x128xf32> to vector<1x1x128xf32>
    %54 = vector.shape_cast %53 : vector<1x1x128xf32> to vector<1x128xf32>
    %55 = vector.shape_cast %54 : vector<1x128xf32> to vector<1x1x128xf32>
    %56 = vector.broadcast %55 : vector<1x1x128xf32> to vector<16x16x128xf32>
    %57 = arith.mulf %52, %56 : vector<16x16x128xf32>
    %58 = arith.addf %51, %57 : vector<16x16x128xf32>
    %59 = vector.extract_strided_slice %12 {offsets = [0, 2, 0], sizes = [18, 16, 128], strides = [1, 1, 1]} : vector<18x18x128xf32> to vector<18x16x128xf32>
    %60 = vector.extract_strided_slice %59 {offsets = [0, 0, 0], sizes = [16, 16, 128], strides = [1, 1, 1]} : vector<18x16x128xf32> to vector<16x16x128xf32>
    %61 = vector.extract_strided_slice %13 {offsets = [2, 0, 0], sizes = [1, 1, 128], strides = [1, 1, 1]} : vector<9x1x128xf32> to vector<1x1x128xf32>
    %62 = vector.shape_cast %61 : vector<1x1x128xf32> to vector<1x128xf32>
    %63 = vector.shape_cast %62 : vector<1x128xf32> to vector<1x1x128xf32>
    %64 = vector.broadcast %63 : vector<1x1x128xf32> to vector<16x16x128xf32>
    %65 = arith.mulf %60, %64 : vector<16x16x128xf32>
    %66 = arith.addf %58, %65 : vector<16x16x128xf32>
    %67 = vector.extract_strided_slice %59 {offsets = [1, 0, 0], sizes = [16, 16, 128], strides = [1, 1, 1]} : vector<18x16x128xf32> to vector<16x16x128xf32>
    %68 = vector.extract_strided_slice %13 {offsets = [5, 0, 0], sizes = [1, 1, 128], strides = [1, 1, 1]} : vector<9x1x128xf32> to vector<1x1x128xf32>
    %69 = vector.shape_cast %68 : vector<1x1x128xf32> to vector<1x128xf32>
    %70 = vector.shape_cast %69 : vector<1x128xf32> to vector<1x1x128xf32>
    %71 = vector.broadcast %70 : vector<1x1x128xf32> to vector<16x16x128xf32>
    %72 = arith.mulf %67, %71 : vector<16x16x128xf32>
    %73 = arith.addf %66, %72 : vector<16x16x128xf32>
    %74 = vector.extract_strided_slice %59 {offsets = [2, 0, 0], sizes = [16, 16, 128], strides = [1, 1, 1]} : vector<18x16x128xf32> to vector<16x16x128xf32>
    %75 = vector.extract_strided_slice %13 {offsets = [8, 0, 0], sizes = [1, 1, 128], strides = [1, 1, 1]} : vector<9x1x128xf32> to vector<1x1x128xf32>
    %76 = vector.shape_cast %75 : vector<1x1x128xf32> to vector<1x128xf32>
    %77 = vector.shape_cast %76 : vector<1x128xf32> to vector<1x1x128xf32>
    %78 = vector.broadcast %77 : vector<1x1x128xf32> to vector<16x16x128xf32>
    %79 = arith.mulf %74, %78 : vector<16x16x128xf32>
    %80 = arith.addf %73, %79 : vector<16x16x128xf32>
    %c0_17 = arith.constant 0 : index
    %c0_18 = arith.constant 0 : index
    %81 = vector.load %arg6[%c0_17, %c0_18] : memref<1x128xf32, #tpu.memory_space<vmem>>, vector<1x128xf32>
    %82 = vector.shape_cast %81 : vector<1x128xf32> to vector<1x1x128xf32>
    %83 = vector.broadcast %82 : vector<1x1x128xf32> to vector<16x16x128xf32>
    %84 = arith.mulf %80, %83 : vector<16x16x128xf32>
    %c0_19 = arith.constant 0 : index
    %c0_20 = arith.constant 0 : index
    %85 = vector.load %arg7[%c0_19, %c0_20] : memref<1x128xf32, #tpu.memory_space<vmem>>, vector<1x128xf32>
    %86 = vector.shape_cast %85 : vector<1x128xf32> to vector<1x1x128xf32>
    %87 = vector.broadcast %86 : vector<1x1x128xf32> to vector<16x16x128xf32>
    %88 = arith.addf %84, %87 : vector<16x16x128xf32>
    %cst_21 = arith.constant 0.000000e+00 : f32
    %89 = vector.broadcast %cst_21 : f32 to vector<16x16x128xf32>
    %90 = arith.maximumf %88, %89 : vector<16x16x128xf32>
    %91 = vector.shape_cast %90 : vector<16x16x128xf32> to vector<256x128xf32>
    %c0_22 = arith.constant 0 : index
    %c0_23 = arith.constant 0 : index
    %92 = vector.load %arg8[%c0_22, %c0_23] : memref<128x128xf32, #tpu.memory_space<vmem>>, vector<128x128xf32>
    %cst_24 = arith.constant dense<0.000000e+00> : vector<256x128xf32>
    %93 = tpu.matmul %91, %92, %cst_24 {dimension_numbers = #tpu.dot_dimension_numbers<[1], [0], [0], [1], [0, 0, 1, 1], [], []>} : vector<256x128xf32>, vector<128x128xf32>, vector<256x128xf32> -> vector<256x128xf32>
    %c0_25 = arith.constant 0 : index
    %c0_26 = arith.constant 0 : index
    %94 = vector.load %arg9[%c0_25, %c0_26] : memref<1x128xf32, #tpu.memory_space<vmem>>, vector<1x128xf32>
    %95 = vector.broadcast %94 : vector<1x128xf32> to vector<256x128xf32>
    %96 = arith.addf %93, %95 : vector<256x128xf32>
    %cst_27 = arith.constant 0.000000e+00 : f32
    %97 = vector.broadcast %cst_27 : f32 to vector<256x128xf32>
    %98 = arith.maximumf %96, %97 : vector<256x128xf32>
    %c0_28 = arith.constant 0 : index
    %c0_29 = arith.constant 0 : index
    %c0_30 = arith.constant 0 : index
    %99 = vector.load %arg10[%c0_28, %c0_29, %c0_30] : memref<1x256x128xf32, #tpu.memory_space<vmem>>, vector<1x256x128xf32>
    %100 = vector.shape_cast %99 : vector<1x256x128xf32> to vector<256x128xf32>
    %101 = vector.shape_cast %98 : vector<256x128xf32> to vector<1x256x128xf32>
    tpu.vector_store %arg10[%c0_28, %c0_29, %c0_30], %101 {strides = array<i32>} : memref<1x256x128xf32, #tpu.memory_space<vmem>>, vector<1x256x128xf32>,
    return
  }
  func.func @transform_0(%arg0: i32, %arg1: i32) -> (i32, i32, i32, i32) {
    %c0_i32 = arith.constant 0 : i32
    %c0_i32_0 = arith.constant 0 : i32
    %c0_i32_1 = arith.constant 0 : i32
    return %arg0, %arg1, %c0_i32, %c0_i32_0 : i32, i32, i32, i32
  }
  func.func @transform_1(%arg0: i32, %arg1: i32) -> (i32, i32, i32, i32) {
    %c16_i32 = arith.constant 16 : i32
    %0 = arith.muli %arg1, %c16_i32 : i32
    %c1_i32 = arith.constant 1 : i32
    %1 = arith.subi %0, %c1_i32 : i32
    %c0_i32 = arith.constant 0 : i32
    %2 = arith.maxsi %1, %c0_i32 : i32
    %c0_i32_0 = arith.constant 0 : i32
    %c0_i32_1 = arith.constant 0 : i32
    %c0_i32_2 = arith.constant 0 : i32
    return %arg0, %2, %c0_i32_0, %c0_i32_1 : i32, i32, i32, i32
  }
  func.func @transform_2(%arg0: i32, %arg1: i32) -> (i32, i32, i32, i32) {
    %c1_i32 = arith.constant 1 : i32
    %0 = arith.addi %arg1, %c1_i32 : i32
    %c16_i32 = arith.constant 16 : i32
    %1 = arith.muli %0, %c16_i32 : i32
    %c15_i32 = arith.constant 15 : i32
    %2 = arith.minsi %1, %c15_i32 : i32
    %c0_i32 = arith.constant 0 : i32
    %c0_i32_0 = arith.constant 0 : i32
    %c0_i32_1 = arith.constant 0 : i32
    return %arg0, %2, %c0_i32, %c0_i32_0 : i32, i32, i32, i32
  }
  func.func @transform_3(%arg0: i32, %arg1: i32) -> (i32, i32, i32) {
    %c0_i32 = arith.constant 0 : i32
    %c0_i32_0 = arith.constant 0 : i32
    %c0_i32_1 = arith.constant 0 : i32
    %c0_i32_2 = arith.constant 0 : i32
    return %c0_i32, %c0_i32_0, %c0_i32_1 : i32, i32, i32
  }
  func.func @transform_4(%arg0: i32, %arg1: i32) -> (i32, i32) {
    %c0_i32 = arith.constant 0 : i32
    %c0_i32_0 = arith.constant 0 : i32
    %c0_i32_1 = arith.constant 0 : i32
    return %c0_i32, %c0_i32_0 : i32, i32
  }
  func.func @transform_5(%arg0: i32, %arg1: i32) -> (i32, i32) {
    %c0_i32 = arith.constant 0 : i32
    %c0_i32_0 = arith.constant 0 : i32
    %c0_i32_1 = arith.constant 0 : i32
    return %c0_i32, %c0_i32_0 : i32, i32
  }
  func.func @transform_6(%arg0: i32, %arg1: i32) -> (i32, i32) {
    %c0_i32 = arith.constant 0 : i32
    %c0_i32_0 = arith.constant 0 : i32
    %c0_i32_1 = arith.constant 0 : i32
    return %c0_i32, %c0_i32_0 : i32, i32
  }
  func.func @transform_7(%arg0: i32, %arg1: i32) -> (i32, i32) {
    %c0_i32 = arith.constant 0 : i32
    %c0_i32_0 = arith.constant 0 : i32
    %c0_i32_1 = arith.constant 0 : i32
    return %c0_i32, %c0_i32_0 : i32, i32
  }
  func.func @transform_8(%arg0: i32, %arg1: i32) -> (i32, i32, i32) {
    %c0_i32 = arith.constant 0 : i32
    %c0_i32_0 = arith.constant 0 : i32
    return %arg0, %arg1, %c0_i32 : i32, i32, i32
  }
}

</mosaic_0001>

<bundles_post_ra>
// kernel: depth_separable_conv2d.1
= control target key start
LH: loop header
LB: loop body
LE: loop exit
PB: predicated region body
PF: predicated region fallthrough
CT: control target
= control target key end

     0   :  { %s2878_s26 = smov 0   ;;  %s2880_s2 = smov 0   ;;  %s5030_s0 = inlined_call_operand.vmem [shape: f32[2,16,18,128], index: 0, kind: input, shape index: {}, may-alias: {0,1,2}]   ;;  %s5031_s1 = inlined_call_operand.vmem [shape: f32[2,16,18,128], index: 1, kind: input, shape index: {}, may-alias: {0,1,2}]   ;;  %s5032_s2 = inlined_call_operand.vmem [shape: f32[2,16,18,128], index: 2, kind: input, shape index: {}, may-alias: {0,1,2}]   ;;  %s5033_s3 = inlined_call_operand.vmem [shape: f32[9,1,128], index: 3, kind: input, shape index: {}]   ;;  %s5034_s4 = inlined_call_operand.vmem [shape: f32[1,128], index: 4, kind: input, shape index: {}]   ;;  %s5035_s5 = inlined_call_operand.vmem [shape: f32[1,128], index: 5, kind: input, shape index: {}]   ;;  %s5036_s6 = inlined_call_operand.vmem [shape: f32[128,128], index: 6, kind: input, shape index: {}]   ;;  %s5037_s7 = inlined_call_operand.vmem [shape: f32[1,128], index: 7, kind: input, shape index: {}]   ;;  %s5038_s8 = inlined_call_operand.vmem [shape: f32[2,256,128], index: 8, kind: output, shape index: {}]  }
   0x1   :  { %s2882_s27 = smov 0  }
   0x2 LB: > { %s30_s28 = sadd.s32 1, %s2827_s2  ;;  %p2647_p0 = scmp.ge.s32.totalorder %s2831_s27, 1  ;;  %s2831_s27 = sphi %s2882_s27, %s18_s27   ;;  %s2827_s2 = sphi %s2880_s2, %s5396_s2   ;;  %s2823_s26 = sphi %s2878_s26, %s5395_s26  }
   0x3   : > { %p32_p1 = scmp.ge.s32.totalorder %s30_s28, 2  ;;  %p348_p2 = scmp.lt.s32.totalorder %s2831_s27, 3 }
   0x5   : > { %s5398_s28 = smov (%p32_p1, %s30_s28), 0  ;;  %p349_p3 = pnand %p2647_p0, %p348_p2 }
   0x7   : > { %352 = sbr.rel (%p349_p3) target bundleno = 486 (0x1e6), region = 52 }
   0xc   : > { %v2329_v0 = vld [vmem:[%s5036_s6 + $0x78] sm:$0xff]  ;;  %v2328_v1 = vld [vmem:[%s5036_s6 + $0x70] sm:$0xff]  ;;  %p418_p4 = scmp.lt.s32.totalorder %s2823_s26, 1  ;;  %v2327_v2 = vld [vmem:[%s5036_s6 + $0x68] sm:$0xff]  ;;  %vm849_vm0 = vcmask 1046528   ;;  %vm1579_vm1 = vcmask 1045504  }
   0xd   : > { %2659 = vmatpush.msra.mxu2 %v2329_v0  ;;  %2660 = vmatpush.msra.mxu3 %v2329_v0  ;;  %v2326_v3 = vld [vmem:[%s5036_s6 + $0x60] sm:$0xff]  ;;  %v2325_v4 = vld [vmem:[%s5036_s6 + $0x58] sm:$0xff]  ;;  %v2324_v5 = vld [vmem:[%s5036_s6 + $0x50] sm:$0xff] }
   0xe   : > { %2334 = vmatpush.msra.mxu0 %v2329_v0  ;;  %2658 = vmatpush.msra.mxu1 %v2329_v0  ;;  %s5400_s26 = smov (!%p418_p4, %s2823_s26), 1  ;;  %v2323_v7 = vld [vmem:[%s5036_s6 + $0x48] sm:$0xff]  ;;  %v2322_v12 = vld [vmem:[%s5036_s6 + $0x40] sm:$0xff]  ;;  %v2321_v27 = vld [vmem:[%s5036_s6 + $0x38] sm:$0xff] }
   0xf   : > { %2662 = vmatpush.msra.mxu2 %v2328_v1  ;;  %2663 = vmatpush.msra.mxu3 %v2328_v1  ;;  %s2706_s15 = smul.u32 384, %s5400_s26  ;;  %v2942_v13 = vld [vmem:[%s5033_s3] ss:$0 sm:$0xff]  ;;  %v2947_v14 = vld [vmem:[%s5033_s3 + $0x3] ss:$0 sm:$0xff]  ;;  %v2320_v38 = vld [vmem:[%s5036_s6 + $0x30] sm:$0xff] }
  0x10   : > { %2335 = vmatpush.msra.mxu0 %v2328_v1  ;;  %2661 = vmatpush.msra.mxu1 %v2328_v1  ;;  %v2952_v15 = vld [vmem:[%s5033_s3 + $0x6] ss:$0 sm:$0xff]  ;;  %v2957_v16 = vld [vmem:[%s5033_s3 + $0x1] ss:$0 sm:$0xff]  ;;  %v2962_v17 = vld [vmem:[%s5033_s3 + $0x4] ss:$0 sm:$0xff] }
  0x11   : > { %2665 = vmatpush.msra.mxu2 %v2327_v2  ;;  %2666 = vmatpush.msra.mxu3 %v2327_v2  ;;  %s2917_s20 = scalar_lea.vmem %s5030_s0, %s2706_s15  ;;  %v2973_v21 = vld [vmem:[%s5033_s3 + $0x7] ss:$0 sm:$0xff]  ;;  %v2978_v22 = vld [vmem:[%s5033_s3 + $0x2] ss:$0 sm:$0xff]  ;;  %v3001_v31 = vld [vmem:[%s5033_s3 + $0x5] ss:$0 sm:$0xff] }
  0x12   : > { %2336 = vmatpush.msra.mxu0 %v2327_v2  ;;  %2664 = vmatpush.msra.mxu1 %v2327_v2  ;;  %v493_v6 = vld [vmem:[%s2917_s20 + $0xa8] sm:$0xff]  ;;  %v494_v8 = vld [vmem:[%s2917_s20 + $0xb0] sm:$0xff]  ;;  %v2928_v9 = vld [vmem:[%s2917_s20 + $0xc0] sm:$0xff]  ;;  %v3004_v32 = vmul.f32 0.0, %v2942_v13 }
  0x13   : > { %2668 = vmatpush.msra.mxu2 %v2326_v3  ;;  %2669 = vmatpush.msra.mxu3 %v2326_v3  ;;  %5205 = vst [vmem:[#allocation2_spill] sm:$0xff] %v2928_v9  ;;  %v2931_v10 = vld [vmem:[%s2917_s20 + $0xd8] sm:$0xff]  ;;  %v2934_v11 = vld [vmem:[%s2917_s20 + $0xc8] sm:$0xff]  ;;  %v2965_v18 = vld [vmem:[%s2917_s20 + $0xe0] sm:$0xff]  ;;  %v568_v19 = vmul.f32 %v2942_v13, %v493_v6  ;;  %v635_v20 = vmul.f32 %v2947_v14, %v2928_v9 }
  0x14   : > { %2337 = vmatpush.msra.mxu0 %v2326_v3  ;;  %2667 = vmatpush.msra.mxu1 %v2326_v3  ;;  %5206 = vst [vmem:[#allocation3_spill] sm:$0xff] %v2931_v10  ;;  %v2981_v23 = vmul.f32 %v2942_v13, %v494_v8  ;;  %v702_v24 = vmul.f32 %v2952_v15, %v2931_v10  ;;  %v3016_v37 = vld [vmem:[%s5033_s3 + $0x8] ss:$0 sm:$0xff]  ;;  %v3042_v53 = vld [vmem:[%s2917_s20 + $0x120] sm:$0xff]  ;;  %v3055_v58 = vld [vmem:[%s2917_s20 + $0x138] sm:$0xff] }
  0x15   : > { %2671 = vmatpush.msra.mxu2 %v2325_v4  ;;  %2672 = vmatpush.msra.mxu3 %v2325_v4  ;;  %5207 = vst [vmem:[#allocation4_spill] sm:$0xff] %v2934_v11  ;;  %v777_v25 = vmul.f32 %v2957_v16, %v493_v6  ;;  %v2987_v26 = vmul.f32 %v2957_v16, %v494_v8  ;;  %v3031_v47 = vld [vmem:[%s2917_s20 + $0x108] sm:$0xff]  ;;  %v2318_v59 = vld [vmem:[%s5036_s6 + $0x20] sm:$0xff]  ;;  %v3065_v63 = vld [vmem:[%s2917_s20 + $0x110] sm:$0xff] }
  0x16   : > { %2338 = vmatpush.msra.mxu0 %v2325_v4  ;;  %2670 = vmatpush.msra.mxu1 %v2325_v4  ;;  %5208 = vst [vmem:[#allocation5_spill] sm:$0xff] %v2965_v18  ;;  %v667_v28 = vadd.f32 %v635_v20, %v568_v19  ;;  %v1021_v29 = vmul.f32 %v2962_v17, %v2928_v9  ;;  %v2319_v48 = vld [vmem:[%s5036_s6 + $0x28] sm:$0xff] }
  0x17   : > { %2674 = vmatpush.msra.mxu2 %v2324_v5  ;;  %2675 = vmatpush.msra.mxu3 %v2324_v5  ;;  %v2996_v30 = vmul.f32 %v2962_v17, %v2934_v11  ;;  %v890_v33 = vrot.slane %v777_v25, 1  ;;  %v5053_v34 = vrot.slane %v2987_v26, 1  ;;  %v1264_v35 = vmul.f32 %v2973_v21, %v2931_v10  ;;  %5209 = vst [vmem:[#allocation6_spill] sm:$0xff] %v3042_v53 }
  0x18   : > { %2339 = vmatpush.msra.mxu0 %v2324_v5  ;;  %2673 = vmatpush.msra.mxu1 %v2324_v5  ;;  %v3011_v36 = vmul.f32 %v2973_v21, %v2965_v18  ;;  %v734_v39 = vadd.f32 %v702_v24, %v667_v28  ;;  %v1133_v40 = vrot.slane %v1021_v29, 1  ;;  %v1507_v42 = vmul.f32 %v2978_v22, %v493_v6  ;;  %v2317_v5 = vld [vmem:[%s5036_s6 + $0x18] sm:$0xff]  ;;  %v3090_v24 = vld [vmem:[%s2917_s20 + $0x140] sm:$0xff]  ;;  %v2316_v29 = vld [vmem:[%s5036_s6 + $0x10] sm:$0xff] }
  0x19   : > { %2677 = vmatpush.msra.mxu2 %v2323_v7  ;;  %2678 = vmatpush.msra.mxu3 %v2323_v7  ;;  %v5050_v41 = vrot.slane %v2996_v30, 1  ;;  %v892_v43 = vsel %vm849_vm0, %v890_v33, %v5053_v34  ;;  %v1376_v44 = vrot.slane %v1264_v35, 1  ;;  %v3028_v46 = vmul.f32 %v2978_v22, %v494_v8  ;;  %5210 = vst [vmem:[#allocation7_spill] sm:$0xff] %v3055_v58  ;;  %v3080_v8 = vld [vmem:[%s2917_s20 + $0x128] sm:$0xff] }
  0x1a   : > { %2340 = vmatpush.msra.mxu0 %v2323_v7  ;;  %2676 = vmatpush.msra.mxu1 %v2323_v7  ;;  %v5049_v45 = vrot.slane %v3011_v36, 1  ;;  %v978_v49 = vadd.f32 %v892_v43, %v734_v39  ;;  %v1620_v51 = vrot.slane %v1507_v42, 2  ;;  %v1751_v52 = vmul.f32 %v3001_v31, %v2928_v9 }
  0x1b   : > { %2680 = vmatpush.msra.mxu2 %v2322_v12  ;;  %2681 = vmatpush.msra.mxu3 %v2322_v12  ;;  %v1135_v50 = vsel %vm849_vm0, %v1133_v40, %v5050_v41  ;;  %v5048_v55 = vrot.slane %v3028_v46, 2  ;;  %v3050_v56 = vmul.f32 %v3001_v31, %v2934_v11  ;;  %v1994_v57 = vmul.f32 %v3016_v37, %v2931_v10  ;;  %v3243_v41 = vld [vmem:[%s2917_s20 + $0x50] sm:$0xff] }
  0x1c   : > { %2341 = vmatpush.msra.mxu0 %v2322_v12  ;;  %2679 = vmatpush.msra.mxu1 %v2322_v12  ;;  %v1378_v54 = vsel %vm849_vm0, %v1376_v44, %v5049_v45  ;;  %v1221_v60 = vadd.f32 %v1135_v50, %v978_v49  ;;  %v1863_v61 = vrot.slane %v1751_v52, 2  ;;  %v3062_v62 = vmul.f32 %v3016_v37, %v2965_v18  ;;  %v3120_v50 = vld [vmem:[%s5034_s4] ss:$0 sm:$0xff] }
  0x1d   : > { %2683 = vmatpush.msra.mxu2 %v2321_v27  ;;  %2684 = vmatpush.msra.mxu3 %v2321_v27  ;;  %v576_v0 = vmul.f32 %v2942_v13, %v3031_v47  ;;  %v1622_v1 = vsel %vm1579_vm1, %v1620_v51, %v5048_v55  ;;  %v5046_v2 = vrot.slane %v3050_v56, 2  ;;  %v2106_v3 = vrot.slane %v1994_v57, 2 }
  0x1e   : > { %2342 = vmatpush.msra.mxu0 %v2321_v27  ;;  %2682 = vmatpush.msra.mxu1 %v2321_v27  ;;  %v643_v4 = vmul.f32 %v2947_v14, %v3042_v53  ;;  %v1464_v6 = vadd.f32 %v1378_v54, %v1221_v60  ;;  %v5045_v7 = vrot.slane %v3062_v62, 2  ;;  %v710_v12 = vmul.f32 %v2952_v15, %v3055_v58 }
  0x1f   : > { %2686 = vmatpush.msra.mxu2 %v2320_v38  ;;  %2687 = vmatpush.msra.mxu3 %v2320_v38  ;;  %v789_v19 = vmul.f32 %v2957_v16, %v3031_v47  ;;  %v1865_v20 = vsel %vm1579_vm1, %v1863_v61, %v5046_v2  ;;  %v3094_v27 = vmul.f32 %v2957_v16, %v3065_v63  ;;  %v3097_v28 = vmul.f32 0.0, %v2957_v16 }
  0x20   : > { %2343 = vmatpush.msra.mxu0 %v2320_v38  ;;  %2685 = vmatpush.msra.mxu1 %v2320_v38  ;;  %v675_v25 = vadd.f32 %v643_v4, %v576_v0  ;;  %v1708_v33 = vadd.f32 %v1622_v1, %v1464_v6  ;;  %v2108_v35 = vsel %vm1579_vm1, %v2106_v3, %v5045_v7  ;;  %v2314_v0 = vld [vmem:[%s5036_s6] sm:$0xff] }
  0x21   : > { %2689 = vmatpush.msra.mxu2 %v2319_v48  ;;  %2690 = vmatpush.msra.mxu3 %v2319_v48  ;;  %v910_v38 = vrot.slane %v789_v19, 1  ;;  %v1033_v39 = vmul.f32 %v2962_v17, %v3042_v53  ;;  %v5044_v42 = vrot.slane %v3094_v27, 1  ;;  %v3110_v43 = vmul.f32 %v2962_v17, %v3080_v8 }
  0x22   : > { %2344 = vmatpush.msra.mxu0 %v2319_v48  ;;  %2688 = vmatpush.msra.mxu1 %v2319_v48  ;;  %v742_v40 = vadd.f32 %v710_v12, %v675_v25  ;;  %v1276_v44 = vmul.f32 %v2973_v21, %v3055_v58  ;;  %v2315_v48 = vld [vmem:[%s5036_s6 + $0x8] sm:$0xff]  ;;  %v1951_v49 = vadd.f32 %v1865_v20, %v1708_v33  ;;  %v3156_v25 = vld [vmem:[%s2917_s20] sm:$0xff] }
  0x23   : > { %2692 = vmatpush.msra.mxu2 %v2318_v59  ;;  %2693 = vmatpush.msra.mxu3 %v2318_v59  ;;  %v1153_v51 = vrot.slane %v1033_v39, 1  ;;  %v3124_v52 = vmul.f32 %v2973_v21, %v3090_v24  ;;  %v1519_v54 = vmul.f32 %v2978_v22, %v3031_v47  ;;  %v912_v57 = vsel %vm849_vm0, %v910_v38, %v5044_v42  ;;  %v3142_v47 = vld [vmem:[%s5035_s5] ss:$0 sm:$0xff]  ;;  %v3165_v39 = vld [vmem:[%s2917_s20 + $0x18] sm:$0xff] }
  0x24   : > { %2345 = vmatpush.msra.mxu0 %v2318_v59  ;;  %2691 = vmatpush.msra.mxu1 %v2318_v59  ;;  %v5043_v59 = vrot.slane %v3110_v43, 1  ;;  %v1396_v60 = vrot.slane %v1276_v44, 1  ;;  %v3134_v61 = vmul.f32 %v2978_v22, %v3065_v63  ;;  %v2194_v1 = vadd.f32 %v2108_v35, %v1951_v49  ;;  %5211 = vst [vmem:[#allocation8_spill] sm:$0xff] %v3156_v25 }
  0x25   : > { %2695 = vmatpush.msra.mxu2 %v2317_v5  ;;  %2696 = vmatpush.msra.mxu3 %v2317_v5  ;;  %v986_v3 = vadd.f32 %v912_v57, %v742_v40  ;;  %v5040_v4 = vrot.slane %v3124_v52, 1  ;;  %v1763_v19 = vmul.f32 %v3001_v31, %v3042_v53  ;;  %v3153_v20 = vmul.f32 %v3001_v31, %v3080_v8 }
  0x26   : > { %2346 = vmatpush.msra.mxu0 %v2317_v5  ;;  %2694 = vmatpush.msra.mxu1 %v2317_v5  ;;  %v1640_v5 = vrot.slane %v1519_v54, 2  ;;  %v1155_v6 = vsel %vm849_vm0, %v1153_v51, %v5043_v59  ;;  %v5039_v12 = vrot.slane %v3134_v61, 2  ;;  %v2230_v33 = vmul.f32 %v3120_v50, %v2194_v1  ;;  %5212 = vst [vmem:[#allocation9_spill] sm:$0xff] %v3165_v39  ;;  %v3177_v1 = vld [vmem:[%s2917_s20 + $0x8] sm:$0xff] }
  0x27   : > { %2698 = vmatpush.msra.mxu2 %v2316_v29  ;;  %2699 = vmatpush.msra.mxu3 %v2316_v29  ;;  %v1398_v35 = vsel %vm849_vm0, %v1396_v60, %v5040_v4  ;;  %v2006_v38 = vmul.f32 %v3016_v37, %v3055_v58  ;;  %v1883_v44 = vrot.slane %v1763_v19, 2  ;;  %v5041_v49 = vrot.slane %v3153_v20, 2 }
  0x28   : > { %2347 = vmatpush.msra.mxu0 %v2316_v29  ;;  %2697 = vmatpush.msra.mxu1 %v2316_v29  ;;  %v1229_v29 = vadd.f32 %v1155_v6, %v986_v3  ;;  %v1642_v40 = vsel %vm1579_vm1, %v1640_v5, %v5039_v12  ;;  %v3173_v51 = vmul.f32 %v3016_v37, %v3090_v24  ;;  %v3180_v3 = vld [vmem:[%s2917_s20 + $0x20] sm:$0xff] }
  0x29   : > { %2701 = vmatpush.msra.mxu2 %v2315_v48  ;;  %2702 = vmatpush.msra.mxu3 %v2315_v48  ;;  %v2266_v54 = vadd.f32 %v3142_v47, %v2230_v33  ;;  %v2126_v60 = vrot.slane %v2006_v38, 2  ;;  %v619_v5 = vmul.f32 %v2947_v14, %v3156_v25  ;;  %v1885_v6 = vsel %vm1579_vm1, %v1883_v44, %v5041_v49 }
  0x2a   : > { %2348 = vmatpush.msra.mxu0 %v2315_v48  ;;  %v1472_v57 = vadd.f32 %v1398_v35, %v1229_v29  ;;  %2700 = vmatpush.msra.mxu1 %v2315_v48  ;;  %v5042_v19 = vrot.slane %v3173_v51, 2  ;;  %v686_v33 = vmul.f32 %v2952_v15, %v3165_v39  ;;  %v5047_v29 = vrot.slane %v3097_v28, 1 }
  0x2b   : > { %2704 = vmatpush.msra.mxu2 %v2314_v0  ;;  %2705 = vmatpush.msra.mxu3 %v2314_v0  ;;  %v2298_v48 = vmax.f32 %v2266_v54, 0.0  ;;  %v651_v38 = vadd.f32 %v619_v5, %v3004_v32  ;;  %v997_v12 = vmul.f32 %v2962_v17, %v3156_v25  ;;  %v3199_v44 = vmul.f32 %v2962_v17, %v3177_v1 }
  0x2c   : > { %2349 = vmatpush.msra.mxu0 %v2314_v0  ;;  %v1716_v35 = vadd.f32 %v1642_v40, %v1472_v57  ;;  %2703 = vmatpush.msra.mxu1 %v2314_v0  ;;  %v2128_v4 = vsel %vm1579_vm1, %v2126_v60, %v5042_v19  ;;  %v1240_v49 = vmul.f32 %v2973_v21, %v3165_v39  ;;  %v3208_v60 = vmul.f32 0.0, %v2978_v22 }
  0x2d   : > { %v3205_v0 = vmul.f32 %v2973_v21, %v3180_v3  ;;  %2398 = vmatmul.f32.vlgmr.msra.gmra.mxu2 %v2298_v48  ;;  %v718_v54 = vadd.f32 %v686_v33, %v651_v38  ;;  %v1093_v57 = vrot.slane %v997_v12, 1  ;;  %v5051_v5 = vrot.slane %v3199_v44, 1  ;;  %v481_v33 = vld [vmem:[%s2917_s20 + $0x48] sm:$0xff]  ;;  %v3223_v48 = vld [vmem:[%s2917_s20 + $0x60] sm:$0xff] }
  0x2e   : > { %v1959_v40 = vadd.f32 %v1885_v6, %v1716_v35  ;;  %v1336_v19 = vrot.slane %v1240_v49, 1  ;;  %v1727_v42 = vmul.f32 %v3001_v31, %v3156_v25  ;;  %v3219_v12 = vmul.f32 %v3001_v31, %v3177_v1  ;;  %5213 = vst [vmem:[#allocation10_spill] sm:$0xff] %v3223_v48  ;;  %v3226_v49 = vld [vmem:[%s2917_s20 + $0x78] sm:$0xff] }
  0x2f   : > { %v5052_v59 = vrot.slane %v3205_v0, 1  ;;  %v962_v2 = vadd.f32 %v5047_v29, %v718_v54  ;;  %5214 = vst [vmem:[#allocation11_spill] sm:$0xff] %v3226_v49  ;;  %v1095_v35 = vsel %vm849_vm0, %v1093_v57, %v5051_v5  ;;  %v3240_v45 = vmul.f32 %v3016_v37, %v3180_v3  ;;  %v3246_v5 = vld [vmem:[%s2917_s20 + $0x68] sm:$0xff] }
  0x30   : > { %v2202_v7 = vadd.f32 %v2128_v4, %v1959_v40  ;;  %v1823_v38 = vrot.slane %v1727_v42, 2  ;;  %v1970_v40 = vmul.f32 %v3016_v37, %v3165_v39  ;;  %v5060_v55 = vrot.slane %v3219_v12, 2 }
  0x31   : > { %v1338_v4 = vsel %vm849_vm0, %v1336_v19, %v5052_v59  ;;  %v1205_v29 = vadd.f32 %v1095_v35, %v962_v2  ;;  %v560_v42 = vmul.f32 %v2942_v13, %v481_v33  ;;  %v627_v19 = vmul.f32 %v2947_v14, %v3223_v48 }
  0x32   : > { %v2238_v54 = vmul.f32 %v3120_v50, %v2202_v7  ;;  %v2066_v57 = vrot.slane %v1970_v40, 2  ;;  %v694_v7 = vmul.f32 %v2952_v15, %v3226_v49  ;;  %v1825_v59 = vsel %vm1579_vm1, %v1823_v38, %v5060_v55  ;;  %v3259_v40 = vld [vmem:[%s2917_s20 + $0x80] sm:$0xff] }
  0x33   : > { %v1448_v35 = vadd.f32 %v1338_v4, %v1205_v29  ;;  %v5068_v34 = vrot.slane %v3240_v45, 2  ;;  %v659_v6 = vadd.f32 %v627_v19, %v560_v42  ;;  %v765_v39 = vmul.f32 %v2957_v16, %v481_v33 }
  0x34   : > { %v2274_v2 = vadd.f32 %v3142_v47, %v2238_v54  ;;  %v3264_v25 = vmul.f32 %v2957_v16, %v3243_v41  ;;  %v1009_v58 = vmul.f32 %v2962_v17, %v3223_v48  ;;  %v5215_v29 = vrot.slane %v3208_v60, 2 }
  0x35   : > { %v2068_v38 = vsel %vm1579_vm1, %v2066_v57, %v5068_v34  ;;  %v3275_v42 = vmul.f32 %v2962_v17, %v3246_v5  ;;  %v726_v19 = vadd.f32 %v694_v7, %v659_v6  ;;  %v870_v55 = vrot.slane %v765_v39, 1 }
  0x36   : > { %v2306_v54 = vmax.f32 %v2274_v2, 0.0  ;;  %v1692_v4 = vadd.f32 %v5215_v29, %v1448_v35  ;;  %v5067_v53 = vrot.slane %v3264_v25, 1  ;;  %v1113_v10 = vrot.slane %v1009_v58, 1 }
  0x37   : > { %v5071_v2 = vrot.slane %v3275_v42, 1  ;;  %v1252_v35 = vmul.f32 %v2973_v21, %v3226_v49  ;;  %v3283_v29 = vmul.f32 %v2973_v21, %v3259_v40  ;;  %v1495_v39 = vmul.f32 %v2978_v22, %v481_v33 }
  0x38   : > { %2422 = vmatmul.f32.vlgmr.msra.gmra.mxu3 %v2306_v54  ;;  %v1935_v9 = vadd.f32 %v1825_v59, %v1692_v4  ;;  %v872_v57 = vsel %vm849_vm0, %v870_v55, %v5067_v53  ;;  %v3291_v58 = vmul.f32 %v2978_v22, %v3243_v41  ;;  %v1739_v59 = vmul.f32 %v3001_v31, %v3223_v48 }
  0x39   : > { %5216 = vst [vmem:[#allocation12_spill] sm:$0xff] %v3283_v29  ;;  %v970_v7 = vadd.f32 %v872_v57, %v726_v19  ;;  %v1115_v54 = vsel %vm849_vm0, %v1113_v10, %v5071_v2  ;;  %v1356_v4 = vrot.slane %v1252_v35, 1  ;;  %v5075_v55 = vrot.slane %v3283_v29, 1  ;;  %v495_v57 = vld [vmem:[%s2917_s20 + $0xb8] sm:$0x3] }
  0x3a   : > { %5217 = vst [vmem:[#allocation13_spill] sm:$0xff] %v3291_v58  ;;  %v2178_v6 = vadd.f32 %v2068_v38, %v1935_v9  ;;  %v1600_v53 = vrot.slane %v1495_v39, 2  ;;  %v5074_v33 = vrot.slane %v3291_v58, 2  ;;  %v3302_v34 = vmul.f32 %v3001_v31, %v3246_v5 }
  0x3b   : > { %v1213_v9 = vadd.f32 %v1115_v54, %v970_v7  ;;  %v1843_v38 = vrot.slane %v1739_v59, 2  ;;  %v1982_v19 = vmul.f32 %v3016_v37, %v3226_v49  ;;  %v1358_v10 = vsel %vm849_vm0, %v1356_v4, %v5075_v55  ;;  %v3324_v49 = vld [vmem:[%s2917_s20 + $0xe8] sm:$0x3] }
  0x3c   : > { %5218 = vst [vmem:[#allocation14_spill] sm:$0xff] %v3302_v34  ;;  %v2214_v48 = vmul.f32 %v3120_v50, %v2178_v6  ;;  %v1602_v35 = vsel %vm1579_vm1, %v1600_v53, %v5074_v33  ;;  %v5080_v39 = vrot.slane %v3302_v34, 2  ;;  %v3317_v2 = vmul.f32 %v3016_v37, %v3259_v40  ;;  %v3320_v6 = vld [vmem:[%s2917_s20 + $0xd0] sm:$0x3] }
  0x3d   : > { %v1456_v7 = vadd.f32 %v1358_v10, %v1213_v9  ;;  %v2086_v54 = vrot.slane %v1982_v19, 2  ;;  %v636_v4 = vmul.f32 %v2947_v14, %v2934_v11  ;;  %v703_v55 = vmul.f32 %v2952_v15, %v2965_v18 }
  0x3e   : > { %5219 = vst [vmem:[#allocation15_spill] sm:$0xff] %v3317_v2  ;;  %v2250_v59 = vadd.f32 %v3142_v47, %v2214_v48  ;;  %v1845_v53 = vsel %vm1579_vm1, %v1843_v38, %v5080_v39  ;;  %v5081_v33 = vrot.slane %v3317_v2, 2  ;;  %v779_v58 = vmul.f32 %v2957_v16, %v495_v57 }
  0x3f   : > { %v1700_v48 = vadd.f32 %v1602_v35, %v1456_v7  ;;  %v668_v9 = vadd.f32 %v636_v4, %v2981_v23  ;;  %v1023_v19 = vmul.f32 %v2962_v17, %v3320_v6  ;;  %v1266_v38 = vmul.f32 %v2973_v21, %v3324_v49 }
  0x40   : > { %v2282_v29 = vmax.f32 %v2250_v59, 0.0  ;;  %v2088_v10 = vsel %vm1579_vm1, %v2086_v54, %v5081_v33  ;;  %v893_v11 = vrot.slane %v779_v58, 1  ;;  %v1509_v39 = vmul.f32 %v2978_v22, %v495_v57 }
  0x41   : > { %v1943_v59 = vadd.f32 %v1845_v53, %v1700_v48  ;;  %v735_v35 = vadd.f32 %v703_v55, %v668_v9  ;;  %v1136_v23 = vrot.slane %v1023_v19, 1  ;;  %v1753_v7 = vmul.f32 %v3001_v31, %v3320_v6  ;;  %v507_v53 = vld [vmem:[%s2917_s20 + $0x118] sm:$0x3]  ;;  %v3356_v48 = vld [vmem:[%s2917_s20 + $0x130] sm:$0x3] }
  0x42   : > { %2350 = vmatmul.f32.vlgmr.msra.gmra.mxu0 %v2282_v29  ;;  %v5220_v4 = vrot.slane %v2987_v26, 1  ;;  %v1379_v58 = vrot.slane %v1266_v38, 1  ;;  %v1623_v33 = vrot.slane %v1509_v39, 2  ;;  %v1996_v2 = vmul.f32 %v3016_v37, %v3324_v49  ;;  %v3365_v38 = vld [vmem:[%s2917_s20 + $0x148] sm:$0x3] }
  0x43   : > { %v2186_v18 = vadd.f32 %v2088_v10, %v1943_v59  ;;  %v5221_v29 = vrot.slane %v2996_v30, 1  ;;  %v1866_v57 = vrot.slane %v1753_v7, 2  ;;  %v5222_v9 = vrot.slane %v3011_v36, 1 }
  0x44   : > { %v894_v54 = vsel %vm849_vm0, %v5220_v4, %v893_v11  ;;  %v5223_v11 = vrot.slane %v3028_v46, 2  ;;  %v2109_v19 = vrot.slane %v1996_v2, 2  ;;  %v577_v30 = vmul.f32 %v2942_v13, %v3065_v63 }
  0x45   : > { %v979_v34 = vadd.f32 %v894_v54, %v735_v35  ;;  %v1137_v55 = vsel %vm849_vm0, %v5221_v29, %v1136_v23  ;;  %v1380_v26 = vsel %vm849_vm0, %v5222_v9, %v1379_v58  ;;  %v2222_v10 = vmul.f32 %v3120_v50, %v2186_v18 }
  0x46   : > { %v1624_v39 = vsel %vm1579_vm1, %v5223_v11, %v1623_v33  ;;  %v5224_v35 = vrot.slane %v3050_v56, 2  ;;  %v644_v36 = vmul.f32 %v2947_v14, %v3080_v8  ;;  %v5225_v46 = vrot.slane %v3062_v62, 2 }
  0x47   : > { %v1222_v59 = vadd.f32 %v1137_v55, %v979_v34  ;;  %v711_v2 = vmul.f32 %v2952_v15, %v3090_v24  ;;  %v791_v7 = vmul.f32 %v2957_v16, %v507_v53  ;;  %v1035_v18 = vmul.f32 %v2962_v17, %v3356_v48 }
  0x48   : > { %v1867_v23 = vsel %vm1579_vm1, %v5224_v35, %v1866_v57  ;;  %v2110_v33 = vsel %vm1579_vm1, %v5225_v46, %v2109_v19  ;;  %v2258_v34 = vadd.f32 %v3142_v47, %v2222_v10  ;;  %v676_v63 = vadd.f32 %v644_v36, %v577_v30  ;;  %v3396_v36 = vld [vmem:[%s2917_s20 + $0x10] sm:$0x3] }
  0x49   : > { %v1465_v56 = vadd.f32 %v1380_v26, %v1222_v59  ;;  %v1278_v4 = vmul.f32 %v2973_v21, %v3365_v38  ;;  %v913_v54 = vrot.slane %v791_v7, 1  ;;  %v1156_v62 = vrot.slane %v1035_v18, 1 }
  0x4a   : > { %v1521_v58 = vmul.f32 %v2978_v22, %v507_v53  ;;  %v1765_v29 = vmul.f32 %v3001_v31, %v3356_v48  ;;  %v2290_v55 = vmax.f32 %v2258_v34, 0.0  ;;  %v743_v9 = vadd.f32 %v711_v2, %v676_v63  ;;  %v3404_v2 = vld [vmem:[%s2917_s20 + $0x28] sm:$0x3] }
  0x4b   : > { %v1709_v57 = vadd.f32 %v1624_v39, %v1465_v56  ;;  %v1399_v11 = vrot.slane %v1278_v4, 1  ;;  %v5226_v19 = vrot.slane %v3094_v27, 1  ;;  %v5227_v30 = vrot.slane %v3110_v43, 1 }
  0x4c   : > { %v1643_v59 = vrot.slane %v1521_v58, 2  ;;  %v1886_v35 = vrot.slane %v1765_v29, 2  ;;  %2374 = vmatmul.f32.vlgmr.msra.gmra.mxu1 %v2290_v55  ;;  %v5228_v7 = vrot.slane %v3124_v52, 1  ;;  %v2008_v27 = vmul.f32 %v3016_v37, %v3365_v38 }
  0x4d   : > { %v914_v26 = vsel %vm849_vm0, %v5226_v19, %v913_v54  ;;  %v1157_v10 = vsel %vm849_vm0, %v5227_v30, %v1156_v62  ;;  %v1952_v53 = vadd.f32 %v1867_v23, %v1709_v57  ;;  %v5229_v43 = vrot.slane %v3134_v61, 2 }
  0x4e   : > { %v987_v46 = vadd.f32 %v914_v26, %v743_v9  ;;  %v1400_v39 = vsel %vm849_vm0, %v5228_v7, %v1399_v11  ;;  %v5230_v34 = vrot.slane %v3153_v20, 2  ;;  %v620_v23 = vmul.f32 %v2947_v14, %v3177_v1  ;;  %v3435_v7 = vld [vmem:[%s2917_s20 + $0x70] sm:$0x3] }
  0x4f   : > { %v1644_v18 = vsel %vm1579_vm1, %v5229_v43, %v1643_v59  ;;  %v687_v52 = vmul.f32 %v2952_v15, %v3180_v3  ;;  %v2195_v63 = vadd.f32 %v2110_v33, %v1952_v53  ;;  %v2129_v54 = vrot.slane %v2008_v27, 2 }
  0x50   : > { %v1887_v56 = vsel %vm1579_vm1, %v5230_v34, %v1886_v35  ;;  %v1230_v4 = vadd.f32 %v1157_v10, %v987_v46  ;;  %v999_v62 = vmul.f32 %v2962_v17, %v3396_v36  ;;  %v652_v61 = vadd.f32 %v620_v23, %v3004_v32  ;;  %v483_v46 = vld [vmem:[%s2917_s20 + $0x58] sm:$0x3] }
  0x51   : > { %v1242_v20 = vmul.f32 %v2973_v21, %v3404_v2  ;;  %v1729_v58 = vmul.f32 %v3001_v31, %v3396_v36  ;;  %v1972_v29 = vmul.f32 %v3016_v37, %v3404_v2  ;;  %v2231_v33 = vmul.f32 %v3120_v50, %v2195_v63 }
  0x52   : > { %v1473_v55 = vadd.f32 %v1400_v39, %v1230_v4  ;;  %v5231_v57 = vrot.slane %v3173_v51, 2  ;;  %v1096_v11 = vrot.slane %v999_v62, 1  ;;  %v719_v32 = vadd.f32 %v687_v52, %v652_v61  ;;  %v3438_v39 = vld [vmem:[%s2917_s20 + $0x88] sm:$0x3] }
  0x53   : > { %v1339_v19 = vrot.slane %v1242_v20, 1  ;;  %v1826_v26 = vrot.slane %v1729_v58, 2  ;;  %v2069_v30 = vrot.slane %v1972_v29, 2  ;;  %v2267_v10 = vadd.f32 %v3142_v47, %v2231_v33  ;;  %5233 = vst [vmem:[#allocation16_spill] sm:$0xff] %v3438_v39 }
  0x54   : > { %v2130_v9 = vsel %vm1579_vm1, %v5231_v57, %v2129_v54  ;;  %v1717_v59 = vadd.f32 %v1644_v18, %v1473_v55  ;;  %v5232_v35 = vrot.slane %v3199_v44, 1  ;;  %v561_v51 = vmul.f32 %v2942_v13, %v3243_v41 }
  0x55   : > { %v5234_v27 = vrot.slane %v3097_v28, 1  ;;  %v5235_v34 = vrot.slane %v3205_v0, 1  ;;  %v5236_v18 = vrot.slane %v3219_v12, 2  ;;  %v5237_v52 = vrot.slane %v3240_v45, 2 }
  0x56   : > { %v1097_v53 = vsel %vm849_vm0, %v5232_v35, %v1096_v11  ;;  %v2299_v4 = vmax.f32 %v2267_v10, 0.0  ;;  %v1960_v54 = vadd.f32 %v1887_v56, %v1717_v59  ;;  %v628_v41 = vmul.f32 %v2947_v14, %v3246_v5 }
  0x57   : > { %v963_v43 = vadd.f32 %v5234_v27, %v719_v32  ;;  %v1340_v23 = vsel %vm849_vm0, %v5235_v34, %v1339_v19  ;;  %v1827_v44 = vsel %vm1579_vm1, %v5236_v18, %v1826_v26  ;;  %v2070_v63 = vsel %vm1579_vm1, %v5237_v52, %v2069_v30  ;;  %v5244_v18 = vld [vmem:[#allocation13_spill] sm:$0xff] }
  0x58   : > { %v695_v28 = vmul.f32 %v2952_v15, %v3259_v40  ;;  %v767_v0 = vmul.f32 %v2957_v16, %v483_v46  ;;  %v1011_v12 = vmul.f32 %v2962_v17, %v3435_v7  ;;  %v1254_v61 = vmul.f32 %v2973_v21, %v3438_v39  ;;  %2401 = vmatmul.f32.gmra.mxu2 %v2299_v4 }
  0x59   : > { %v1206_v62 = vadd.f32 %v1097_v53, %v963_v43  ;;  %v2203_v45 = vadd.f32 %v2130_v9, %v1960_v54  ;;  %v660_v20 = vadd.f32 %v628_v41, %v561_v51  ;;  %v1497_v56 = vmul.f32 %v2978_v22, %v483_v46  ;;  %v5241_v46 = vld [vmem:[#allocation12_spill] sm:$0xff] }
  0x5a   : > { %v1741_v58 = vmul.f32 %v3001_v31, %v3435_v7  ;;  %v873_v33 = vrot.slane %v767_v0, 1  ;;  %v1116_v55 = vrot.slane %v1011_v12, 1  ;;  %v1359_v57 = vrot.slane %v1254_v61, 1  ;;  %v3478_v43 = vld [vmem:[%s2917_s20 + $0xf0] sm:$0xff]  ;;  %v5249_v0 = vld [vmem:[#allocation3_spill] sm:$0xff] }
  0x5b   : > { %v1449_v29 = vadd.f32 %v1340_v23, %v1206_v62  ;;  %v2239_v11 = vmul.f32 %v3120_v50, %v2203_v45  ;;  %v727_v32 = vadd.f32 %v695_v28, %v660_v20  ;;  %v1603_v19 = vrot.slane %v1497_v56, 2  ;;  %5243 = vst [vmem:[#allocation12_spill] sm:$0xff] %v3478_v43  ;;  %v5248_v28 = vld [vmem:[#allocation2_spill] sm:$0xff] }
  0x5c   : > { %v1846_v26 = vrot.slane %v1741_v58, 2  ;;  %v5238_v30 = vrot.slane %v3208_v60, 2  ;;  %v5239_v9 = vrot.slane %v3264_v25, 1  ;;  %v5240_v35 = vrot.slane %v3275_v42, 1  ;;  %v5246_v25 = vld [vmem:[#allocation14_spill] sm:$0xff] }
  0x5d   : > { %v5242_v51 = vrot.slane %v5241_v46, 1  ;;  %v2275_v34 = vadd.f32 %v3142_v47, %v2239_v11  ;;  %v5245_v60 = vrot.slane %v5244_v18, 2  ;;  %v5247_v4 = vrot.slane %v5246_v25, 2  ;;  %v3502_v11 = vld [vmem:[%s2917_s20 + $0xf8] sm:$0xff] }
  0x5e   : > { %v1693_v10 = vadd.f32 %v5238_v30, %v1449_v29  ;;  %v874_v59 = vsel %vm849_vm0, %v5239_v9, %v873_v33  ;;  %v1117_v53 = vsel %vm849_vm0, %v5240_v35, %v1116_v55  ;;  %v1984_v41 = vmul.f32 %v3016_v37, %v3438_v39  ;;  %v5250_v33 = vld [vmem:[#allocation4_spill] sm:$0xff]  ;;  %5251 = vst [vmem:[#allocation13_spill] sm:$0xff] %v3502_v11  ;;  %v3835_v39 = vld [vmem:[%s2917_s20 + $0xe0] sm:$0xff] }
  0x5f   : > { %v1360_v27 = vsel %vm849_vm0, %v5242_v51, %v1359_v57  ;;  %v971_v23 = vadd.f32 %v874_v59, %v727_v32  ;;  %v1604_v52 = vsel %vm1579_vm1, %v5245_v60, %v1603_v19  ;;  %v1847_v42 = vsel %vm1579_vm1, %v5247_v4, %v1846_v26  ;;  %v5252_v26 = vld [vmem:[#allocation5_spill] sm:$0xff] }
  0x60   : > { %v1936_v54 = vadd.f32 %v1827_v44, %v1693_v10  ;;  %v570_v62 = vmul.f32 %v2942_v13, %v5248_v28  ;;  %v637_v12 = vmul.f32 %v2947_v14, %v5249_v0  ;;  %v2307_v61 = vmax.f32 %v2275_v34, 0.0  ;;  %v5253_v10 = vld [vmem:[#allocation15_spill] sm:$0xff] }
  0x61   : > { %v1214_v45 = vadd.f32 %v1117_v53, %v971_v23  ;;  %v704_v20 = vmul.f32 %v2952_v15, %v3478_v43  ;;  %v780_v56 = vmul.f32 %v2957_v16, %v5248_v28  ;;  %v2089_v29 = vrot.slane %v1984_v41, 2 }
  0x62   : > { %v2179_v58 = vadd.f32 %v2070_v63, %v1936_v54  ;;  %v669_v44 = vadd.f32 %v637_v12, %v570_v62  ;;  %v3499_v55 = vmul.f32 %v2957_v16, %v5250_v33  ;;  %2425 = vmatmul.f32.gmra.mxu3 %v2307_v61  ;;  %v1024_v19 = vmul.f32 %v2962_v17, %v5249_v0 }
  0x63   : > { %v1457_v57 = vadd.f32 %v1360_v27, %v1214_v45  ;;  %v895_v32 = vrot.slane %v780_v56, 1  ;;  %v3508_v30 = vmul.f32 %v2962_v17, %v5252_v26  ;;  %v5254_v9 = vrot.slane %v5253_v10, 2 }
  0x64   : > { %v2215_v63 = vmul.f32 %v3120_v50, %v2179_v58  ;;  %v736_v35 = vadd.f32 %v704_v20, %v669_v44  ;;  %v5103_v53 = vrot.slane %v3499_v55, 1  ;;  %v1138_v51 = vrot.slane %v1024_v19, 1 }
  0x65   : > { %v2090_v59 = vsel %vm1579_vm1, %v5254_v9, %v2089_v29  ;;  %v1701_v46 = vadd.f32 %v1604_v52, %v1457_v57  ;;  %v5101_v27 = vrot.slane %v3508_v30, 1  ;;  %v1267_v34 = vmul.f32 %v2973_v21, %v3478_v43 }
  0x66   : > { %v2251_v23 = vadd.f32 %v3142_v47, %v2215_v63  ;;  %v897_v18 = vsel %vm849_vm0, %v895_v32, %v5103_v53  ;;  %v3524_v60 = vmul.f32 %v2973_v21, %v3502_v11  ;;  %v1510_v25 = vmul.f32 %v2978_v22, %v5248_v28 }
  0x67   : > { %v1944_v52 = vadd.f32 %v1847_v42, %v1701_v46  ;;  %v980_v4 = vadd.f32 %v897_v18, %v736_v35  ;;  %v1140_v54 = vsel %vm849_vm0, %v1138_v51, %v5101_v27  ;;  %v1381_v41 = vrot.slane %v1267_v34, 1 }
  0x68   : > { %v2283_v62 = vmax.f32 %v2251_v23, 0.0  ;;  %v5100_v12 = vrot.slane %v3524_v60, 1  ;;  %v3534_v61 = vmul.f32 %v2978_v22, %v5250_v33  ;;  %v1625_v45 = vrot.slane %v1510_v25, 2  ;;  %v5257_v23 = vld [vmem:[#allocation7_spill] sm:$0xff] }
  0x69   : > { %v2187_v20 = vadd.f32 %v2090_v59, %v1944_v52  ;;  %v1223_v56 = vadd.f32 %v1140_v54, %v980_v4  ;;  %v1754_v42 = vmul.f32 %v3001_v31, %v5249_v0  ;;  %v3540_v28 = vmul.f32 %v3001_v31, %v5252_v26  ;;  %v3555_v26 = vld [vmem:[%s2917_s20 + $0x150] sm:$0xff]  ;;  %v5256_v59 = vld [vmem:[#allocation6_spill] sm:$0xff]  ;;  %v3573_v52 = vld [vmem:[%s2917_s20 + $0x158] sm:$0xff] }
  0x6a   : > { %2353 = vmatmul.f32.gmra.mxu0 %v2283_v62  ;;  %v1383_v58 = vsel %vm849_vm0, %v1381_v41, %v5100_v12  ;;  %v5099_v29 = vrot.slane %v3534_v61, 2  ;;  %v1997_v44 = vmul.f32 %v3016_v37, %v3478_v43  ;;  %v3550_v33 = vmul.f32 %v3016_v37, %v3502_v11  ;;  %5255 = vst [vmem:[#allocation14_spill] sm:$0xff] %v3555_v26 }
  0x6b   : > { %v2223_v0 = vmul.f32 %v3120_v50, %v2187_v20  ;;  %v1466_v57 = vadd.f32 %v1383_v58, %v1223_v56  ;;  %v1868_v32 = vrot.slane %v1754_v42, 2  ;;  %v5098_v19 = vrot.slane %v3540_v28, 2 }
  0x6c   : > { %v1627_v63 = vsel %vm1579_vm1, %v1625_v45, %v5099_v29  ;;  %v2111_v10 = vrot.slane %v1997_v44, 2  ;;  %v5091_v9 = vrot.slane %v3550_v33, 2  ;;  %v578_v35 = vmul.f32 %v2942_v13, %v5256_v59 }
  0x6d   : > { %v2259_v46 = vadd.f32 %v3142_v47, %v2223_v0  ;;  %v1710_v51 = vadd.f32 %v1627_v63, %v1466_v57  ;;  %v1870_v34 = vsel %vm1579_vm1, %v1868_v32, %v5098_v19  ;;  %v645_v18 = vmul.f32 %v2947_v14, %v5257_v23 }
  0x6e   : > { %v2113_v25 = vsel %vm1579_vm1, %v2111_v10, %v5091_v9  ;;  %v712_v4 = vmul.f32 %v2952_v15, %v3555_v26  ;;  %v792_v54 = vmul.f32 %v2957_v16, %v5256_v59  ;;  %v3581_v41 = vmul.f32 %v2957_v16, %v3080_v8 }
  0x6f   : > { %v2291_v62 = vmax.f32 %v2259_v46, 0.0  ;;  %v1953_v45 = vadd.f32 %v1870_v34, %v1710_v51  ;;  %v677_v20 = vadd.f32 %v645_v18, %v578_v35  ;;  %v1036_v56 = vmul.f32 %v2962_v17, %v5257_v23 }
  0x70   : > { %v915_v42 = vrot.slane %v792_v54, 1  ;;  %v5088_v58 = vrot.slane %v3581_v41, 1  ;;  %v3588_v44 = vmul.f32 %v2962_v17, %v3090_v24  ;;  %v1279_v0 = vmul.f32 %v2973_v21, %v3555_v26 }
  0x71   : > { %2377 = vmatmul.f32.gmra.mxu1 %v2291_v62  ;;  %v2196_v57 = vadd.f32 %v2113_v25, %v1953_v45  ;;  %v744_v32 = vadd.f32 %v712_v4, %v677_v20  ;;  %v1158_v63 = vrot.slane %v1036_v56, 1  ;;  %v3594_v10 = vmul.f32 %v2973_v21, %v3573_v52 }
  0x72   : > { %v917_v35 = vsel %vm849_vm0, %v915_v42, %v5088_v58  ;;  %v5087_v46 = vrot.slane %v3588_v44, 1  ;;  %v1401_v51 = vrot.slane %v1279_v0, 1  ;;  %v1522_v34 = vmul.f32 %v2978_v22, %v5256_v59 }
  0x73   : > { %v2232_v18 = vmul.f32 %v3120_v50, %v2196_v57  ;;  %v988_v25 = vadd.f32 %v917_v35, %v744_v32  ;;  %v5086_v4 = vrot.slane %v3594_v10, 1  ;;  %v3606_v54 = vmul.f32 %v2978_v22, %v3080_v8 }
  0x74   : > { %v1160_v62 = vsel %vm849_vm0, %v1158_v63, %v5087_v46  ;;  %v1645_v45 = vrot.slane %v1522_v34, 2  ;;  %v1766_v20 = vmul.f32 %v3001_v31, %v5257_v23  ;;  %v3615_v59 = vmul.f32 %v3001_v31, %v3090_v24  ;;  %v3630_v63 = vld [vmem:[%s2917_s20 + $0x30] sm:$0xff]  ;;  %v5260_v46 = vld [vmem:[#allocation9_spill] sm:$0xff] }
  0x75   : > { %v2268_v56 = vadd.f32 %v3142_v47, %v2232_v18  ;;  %v1231_v42 = vadd.f32 %v1160_v62, %v988_v25  ;;  %v1403_v8 = vsel %vm849_vm0, %v1401_v51, %v5086_v4  ;;  %v5090_v0 = vrot.slane %v3606_v54, 2  ;;  %5258 = vst [vmem:[#allocation2_spill] sm:$0xff] %v3630_v63  ;;  %v5259_v18 = vld [vmem:[#allocation8_spill] sm:$0xff] }
  0x76   : > { %v1888_v57 = vrot.slane %v1766_v20, 2  ;;  %v5089_v32 = vrot.slane %v3615_v59, 2  ;;  %v2009_v23 = vmul.f32 %v3016_v37, %v3555_v26  ;;  %v3627_v24 = vmul.f32 %v3016_v37, %v3573_v52  ;;  %v3781_v26 = vld [vmem:[%s5033_s3 + $0x2] ss:$0 sm:$0xff]  ;;  %5270 = vst [vmem:[#allocation9_spill] sm:$0xff] %v3835_v39 }
  0x77   : > { %v2300_v35 = vmax.f32 %v2268_v56, 0.0  ;;  %v1474_v34 = vadd.f32 %v1403_v8, %v1231_v42  ;;  %v1647_v51 = vsel %vm1579_vm1, %v1645_v45, %v5090_v0  ;;  %v554_v25 = vmul.f32 %v2942_v13, %v5259_v18  ;;  %v3644_v42 = vld [vmem:[%s2917_s20 + $0x38] sm:$0xff] }
  0x78   : > { %v1890_v62 = vsel %vm1579_vm1, %v1888_v57, %v5089_v32  ;;  %v2131_v20 = vrot.slane %v2009_v23, 2  ;;  %v5097_v4 = vrot.slane %v3627_v24, 2  ;;  %v621_v58 = vmul.f32 %v2947_v14, %v5260_v46 }
  0x79   : > { %2404 = vmatmul.f32.gmra.mxu2 %v2300_v35  ;;  %v1718_v56 = vadd.f32 %v1647_v51, %v1474_v34  ;;  %v688_v45 = vmul.f32 %v2952_v15, %v3630_v63  ;;  %v756_v13 = vmul.f32 %v2957_v16, %v5259_v18  ;;  %v3652_v8 = vmul.f32 %v2957_v16, %v3177_v1 }
  0x7a   : > { %v2133_v57 = vsel %vm1579_vm1, %v2131_v20, %v5097_v4  ;;  %v653_v23 = vadd.f32 %v621_v58, %v554_v25  ;;  %v1000_v14 = vmul.f32 %v2962_v17, %v5260_v46  ;;  %v3661_v35 = vmul.f32 %v2962_v17, %v3180_v3  ;;  %v3754_v4 = vld [vmem:[%s5033_s3 + $0x4] ss:$0 sm:$0xff] }
  0x7b   : > { %v1961_v15 = vadd.f32 %v1890_v62, %v1718_v56  ;;  %v855_v34 = vrot.slane %v756_v13, 1  ;;  %v5096_v51 = vrot.slane %v3652_v8, 1  ;;  %v1243_v16 = vmul.f32 %v2973_v21, %v3630_v63 }
  0x7c   : > { %v720_v32 = vadd.f32 %v688_v45, %v653_v23  ;;  %v1098_v0 = vrot.slane %v1000_v14, 1  ;;  %v5095_v9 = vrot.slane %v3661_v35, 1  ;;  %v3669_v58 = vmul.f32 %v2973_v21, %v3644_v42 }
  0x7d   : > { %v2204_v25 = vadd.f32 %v2133_v57, %v1961_v15  ;;  %v857_v17 = vsel %vm849_vm0, %v855_v34, %v5096_v51  ;;  %v1341_v62 = vrot.slane %v1243_v16, 1  ;;  %v1486_v20 = vmul.f32 %v2978_v22, %v5259_v18 }
  0x7e   : > { %v964_v56 = vadd.f32 %v857_v17, %v720_v32  ;;  %v1100_v45 = vsel %vm849_vm0, %v1098_v0, %v5095_v9  ;;  %v5093_v13 = vrot.slane %v3669_v58, 1  ;;  %v3682_v21 = vmul.f32 %v2978_v22, %v3177_v1 }
  0x7f   : > { %v2240_v57 = vmul.f32 %v3120_v50, %v2204_v25  ;;  %v1585_v23 = vrot.slane %v1486_v20, 2  ;;  %v1730_v14 = vmul.f32 %v3001_v31, %v5260_v46  ;;  %v3689_v32 = vmul.f32 %v3001_v31, %v3180_v3  ;;  %v3704_v25 = vld [vmem:[%s2917_s20 + $0x90] sm:$0xff] }
  0x80   : > { %v1207_v18 = vadd.f32 %v1100_v45, %v964_v56  ;;  %v1343_v0 = vsel %vm849_vm0, %v1341_v62, %v5093_v13  ;;  %v5092_v15 = vrot.slane %v3682_v21, 2  ;;  %v1973_v22 = vmul.f32 %v3016_v37, %v3630_v63  ;;  %5262 = vst [vmem:[#allocation4_spill] sm:$0xff] %v3704_v25  ;;  %v3712_v56 = vld [vmem:[%s5033_s3] ss:$0 sm:$0xff]  ;;  %v3728_v13 = vld [vmem:[%s2917_s20 + $0x98] sm:$0xff] }
  0x81   : > { %v2276_v34 = vadd.f32 %v3142_v47, %v2240_v57  ;;  %v1828_v16 = vrot.slane %v1730_v14, 2  ;;  %v5094_v46 = vrot.slane %v3689_v32, 2  ;;  %v3701_v31 = vmul.f32 %v3016_v37, %v3644_v42  ;;  %v5263_v45 = vld [vmem:[#allocation10_spill] sm:$0xff] }
  0x82   : > { %v1450_v17 = vadd.f32 %v1343_v0, %v1207_v18  ;;  %v1587_v62 = vsel %vm1579_vm1, %v1585_v23, %v5092_v15  ;;  %v2071_v20 = vrot.slane %v1973_v22, 2  ;;  %v562_v57 = vmul.f32 %v3712_v56, %v5263_v45  ;;  %v3723_v23 = vld [vmem:[%s5033_s3 + $0x3] ss:$0 sm:$0xff]  ;;  %v5264_v0 = vld [vmem:[#allocation11_spill] sm:$0xff] }
  0x83   : > { %5261 = vst [vmem:[#allocation3_spill] sm:$0xff] %v3701_v31  ;;  %v2308_v14 = vmax.f32 %v2276_v34, 0.0  ;;  %v1830_v37 = vsel %vm1579_vm1, %v1828_v16, %v5094_v46  ;;  %v5102_v18 = vrot.slane %v3701_v31, 2  ;;  %v629_v22 = vmul.f32 %v3723_v23, %v5264_v0  ;;  %v3733_v34 = vld [vmem:[%s5033_s3 + $0x6] ss:$0 sm:$0xff] }
  0x84   : > { %v1694_v15 = vadd.f32 %v1587_v62, %v1450_v17  ;;  %v696_v16 = vmul.f32 %v3733_v34, %v3704_v25  ;;  %v3740_v46 = vld [vmem:[%s5033_s3 + $0x1] ss:$0 sm:$0xff]  ;;  %v1012_v19 = vmul.f32 %v3754_v4, %v5264_v0  ;;  %v3760_v29 = vmul.f32 %v3754_v4, %v3259_v40 }
  0x85   : > { %v768_v9 = vmul.f32 %v3740_v46, %v5263_v45  ;;  %v3746_v17 = vmul.f32 %v3740_v46, %v3246_v5  ;;  %2428 = vmatmul.f32.gmra.mxu3 %v2308_v14  ;;  %v2073_v62 = vsel %vm1579_vm1, %v2071_v20, %v5102_v18  ;;  %v661_v51 = vadd.f32 %v629_v22, %v562_v57  ;;  %v3766_v20 = vld [vmem:[%s5033_s3 + $0x7] ss:$0 sm:$0xff] }
  0x86   : > { %5266 = vst [vmem:[#allocation15_spill] sm:$0xff] %v3760_v29  ;;  %v1937_v12 = vadd.f32 %v1830_v37, %v1694_v15  ;;  %v1255_v57 = vmul.f32 %v3766_v20, %v3704_v25  ;;  %v1118_v18 = vrot.slane %v1012_v19, 1  ;;  %v5109_v53 = vrot.slane %v3760_v29, 1  ;;  %v3826_v29 = vld [vmem:[%s2917_s20 + $0x100] sm:$0x3] }
  0x87   : > { %5265 = vst [vmem:[#allocation5_spill] sm:$0xff] %v3746_v17  ;;  %v875_v27 = vrot.slane %v768_v9, 1  ;;  %v5108_v14 = vrot.slane %v3746_v17, 1  ;;  %v728_v22 = vadd.f32 %v696_v16, %v661_v51  ;;  %v3773_v63 = vmul.f32 %v3766_v20, %v3728_v13  ;;  %v2752_v17 = vld [vmem:[%s2917_s20 + $0xc8] sm:$0xff] }
  0x88   : > { %v2180_v15 = vadd.f32 %v2073_v62, %v1937_v12  ;;  %v1361_v37 = vrot.slane %v1255_v57, 1  ;;  %v1498_v19 = vmul.f32 %v3781_v26, %v5263_v45  ;;  %v1120_v16 = vsel %vm849_vm0, %v1118_v18, %v5109_v53 }
  0x89   : > { %5267 = vst [vmem:[#allocation6_spill] sm:$0xff] %v3773_v63  ;;  %v877_v9 = vsel %vm849_vm0, %v875_v27, %v5108_v14  ;;  %v5112_v12 = vrot.slane %v3773_v63, 1  ;;  %v3791_v62 = vmul.f32 %v3781_v26, %v3246_v5  ;;  %v3797_v14 = vld [vmem:[%s5033_s3 + $0x5] ss:$0 sm:$0xff] }
  0x8a   : > { %v972_v51 = vadd.f32 %v877_v9, %v728_v22  ;;  %v2216_v27 = vmul.f32 %v3120_v50, %v2180_v15  ;;  %v1605_v57 = vrot.slane %v1498_v19, 2  ;;  %v1742_v45 = vmul.f32 %v3797_v14, %v5264_v0  ;;  %v3812_v19 = vld [vmem:[%s5033_s3 + $0x8] ss:$0 sm:$0xff] }
  0x8b   : > { %v3803_v18 = vmul.f32 %v3797_v14, %v3259_v40  ;;  %v1363_v15 = vsel %vm849_vm0, %v1361_v37, %v5112_v12  ;;  %v5122_v9 = vrot.slane %v3791_v62, 2  ;;  %v1985_v0 = vmul.f32 %v3812_v19, %v3704_v25 }
  0x8c   : > { %v1215_v22 = vadd.f32 %v1120_v16, %v972_v51  ;;  %v2252_v53 = vadd.f32 %v3142_v47, %v2216_v27  ;;  %v1848_v43 = vrot.slane %v1742_v45, 2  ;;  %v3820_v16 = vmul.f32 %v3812_v19, %v3728_v13 }
  0x8d   : > { %5268 = vst [vmem:[#allocation7_spill] sm:$0xff] %v3803_v18  ;;  %v5121_v51 = vrot.slane %v3803_v18, 2  ;;  %v1607_v12 = vsel %vm1579_vm1, %v1605_v57, %v5122_v9  ;;  %v2091_v63 = vrot.slane %v1985_v0, 2  ;;  %v571_v25 = vmul.f32 %v2752_v17, %v3712_v56 }
  0x8e   : > { %5269 = vst [vmem:[#allocation8_spill] sm:$0xff] %v3820_v16  ;;  %v1458_v37 = vadd.f32 %v1363_v15, %v1215_v22  ;;  %v2284_v31 = vmax.f32 %v2252_v53, 0.0  ;;  %v2092_v45 = vrot.slane %v3820_v16, 2  ;;  %v638_v22 = vmul.f32 %v3835_v39, %v3723_v23 }
  0x8f   : > { %v1850_v27 = vsel %vm1579_vm1, %v1848_v43, %v5121_v51  ;;  %v705_v57 = vmul.f32 %v3733_v34, %v3502_v11  ;;  %v782_v0 = vmul.f32 %v3740_v46, %v3320_v6  ;;  %v1026_v53 = vmul.f32 %v3754_v4, %v3324_v49 }
  0x90   : > { %v1702_v15 = vadd.f32 %v1607_v12, %v1458_v37  ;;  %2356 = vmatmul.f32.gmra.mxu0 %v2284_v31  ;;  %v2093_v43 = vsel %vm1579_vm1, %v2091_v63, %v2092_v45  ;;  %v670_v17 = vadd.f32 %v638_v22, %v571_v25  ;;  %v1269_v51 = vmul.f32 %v3766_v20, %v3826_v29 }
  0x91   : > { %v1512_v12 = vmul.f32 %v3781_v26, %v3320_v6  ;;  %v898_v9 = vrot.slane %v782_v0, 1  ;;  %v1141_v11 = vrot.slane %v1026_v53, 1  ;;  %v1756_v39 = vmul.f32 %v3797_v14, %v3324_v49 }
  0x92   : > { %v1945_v37 = vadd.f32 %v1850_v27, %v1702_v15  ;;  %v737_v31 = vadd.f32 %v705_v57, %v670_v17  ;;  %v1384_v18 = vrot.slane %v1269_v51, 1  ;;  %v1999_v63 = vmul.f32 %v3812_v19, %v3826_v29 }
  0x93   : > { %v1628_v16 = vrot.slane %v1512_v12, 2  ;;  %v5271_v22 = vrot.slane %v3499_v55, 1  ;;  %v5272_v27 = vrot.slane %v3508_v30, 1  ;;  %v1871_v0 = vrot.slane %v1756_v39, 2 }
  0x94   : > { %v2188_v25 = vadd.f32 %v2093_v43, %v1945_v37  ;;  %v5273_v49 = vrot.slane %v3524_v60, 1  ;;  %v5274_v57 = vrot.slane %v3534_v61, 2  ;;  %v2114_v12 = vrot.slane %v1999_v63, 2  ;;  %v3869_v43 = vld [vmem:[%s2917_s20 + $0x160] sm:$0x3] }
  0x95   : > { %v899_v6 = vsel %vm849_vm0, %v5271_v22, %v898_v9  ;;  %v1142_v15 = vsel %vm849_vm0, %v5272_v27, %v1141_v11  ;;  %v5275_v9 = vrot.slane %v3540_v28, 2  ;;  %v3876_v11 = vld [vmem:[%s2917_s20 + $0x128] sm:$0xff]  ;;  %v3881_v60 = vld [vmem:[%s2917_s20 + $0x140] sm:$0xff]  ;;  %v794_v28 = vmul.f32 %v3740_v46, %v3356_v48 }
  0x96   : > { %v981_v53 = vadd.f32 %v899_v6, %v737_v31  ;;  %v1385_v51 = vsel %vm849_vm0, %v5273_v49, %v1384_v18  ;;  %v1629_v17 = vsel %vm1579_vm1, %v5274_v57, %v1628_v16  ;;  %v2224_v55 = vmul.f32 %v3120_v50, %v2188_v25  ;;  %5276 = vst [vmem:[#allocation10_spill] sm:$0xff] %v3876_v11 }
  0x97   : > { %v1872_v30 = vsel %vm1579_vm1, %v5275_v9, %v1871_v0  ;;  %v579_v39 = vmul.f32 %v3876_v11, %v3712_v56  ;;  %v646_v61 = vmul.f32 %v3881_v60, %v3723_v23  ;;  %v5277_v16 = vrot.slane %v3550_v33, 2 }
  0x98   : > { %v1224_v18 = vadd.f32 %v1142_v15, %v981_v53  ;;  %v713_v50 = vmul.f32 %v3733_v34, %v3573_v52  ;;  %v2260_v31 = vadd.f32 %v3142_v47, %v2224_v55  ;;  %v1038_v25 = vmul.f32 %v3754_v4, %v3365_v38 }
  0x99   : > { %v2115_v37 = vsel %vm1579_vm1, %v5277_v16, %v2114_v12  ;;  %v678_v63 = vadd.f32 %v646_v61, %v579_v39  ;;  %v1281_v22 = vmul.f32 %v3766_v20, %v3869_v43  ;;  %v918_v27 = vrot.slane %v794_v28, 1 }
  0x9a   : > { %v1467_v6 = vadd.f32 %v1385_v51, %v1224_v18  ;;  %v1524_v33 = vmul.f32 %v3781_v26, %v3356_v48  ;;  %v1768_v15 = vmul.f32 %v3797_v14, %v3365_v38  ;;  %v2292_v0 = vmax.f32 %v2260_v31, 0.0 }
  0x9b   : > { %v745_v53 = vadd.f32 %v713_v50, %v678_v63  ;;  %v1161_v49 = vrot.slane %v1038_v25, 1  ;;  %v1404_v47 = vrot.slane %v1281_v22, 1  ;;  %v5278_v12 = vrot.slane %v3581_v41, 1 }
  0x9c   : > { %v1711_v57 = vadd.f32 %v1629_v17, %v1467_v6  ;;  %v1648_v9 = vrot.slane %v1524_v33, 2  ;;  %v1891_v39 = vrot.slane %v1768_v15, 2  ;;  %2380 = vmatmul.f32.gmra.mxu1 %v2292_v0  ;;  %v5279_v61 = vrot.slane %v3588_v44, 1  ;;  %v3913_v17 = vld [vmem:[%s2917_s20 + $0x40] sm:$0x3] }
  0x9d   : > { %v919_v55 = vsel %vm849_vm0, %v5278_v12, %v918_v27  ;;  %v5280_v18 = vrot.slane %v3594_v10, 1  ;;  %v2011_v16 = vmul.f32 %v3812_v19, %v3869_v43  ;;  %v5281_v50 = vrot.slane %v3606_v54, 2 }
  0x9e   : > { %v989_v51 = vadd.f32 %v919_v55, %v745_v53  ;;  %v1162_v48 = vsel %vm849_vm0, %v5279_v61, %v1161_v49  ;;  %v1954_v41 = vadd.f32 %v1872_v30, %v1711_v57  ;;  %v5282_v31 = vrot.slane %v3615_v59, 2 }
  0x9f   : > { %v1405_v38 = vsel %vm849_vm0, %v5280_v18, %v1404_v47  ;;  %v1649_v28 = vsel %vm1579_vm1, %v5281_v50, %v1648_v9  ;;  %v555_v63 = vmul.f32 %v3712_v56, %v3177_v1  ;;  %v2134_v25 = vrot.slane %v2011_v16, 2 }
  0xa0   : > { %v1892_v44 = vsel %vm1579_vm1, %v5282_v31, %v1891_v39  ;;  %v1232_v10 = vadd.f32 %v1162_v48, %v989_v51  ;;  %v622_v22 = vmul.f32 %v3723_v23, %v3180_v3  ;;  %v689_v6 = vmul.f32 %v3733_v34, %v3644_v42 }
  0xa1   : > { %v2197_v30 = vadd.f32 %v2115_v37, %v1954_v41  ;;  %v758_v54 = vmul.f32 %v3740_v46, %v3396_v36  ;;  %v1002_v59 = vmul.f32 %v3754_v4, %v3404_v2  ;;  %v1245_v27 = vmul.f32 %v3766_v20, %v3913_v17  ;;  %v3941_v37 = vld [vmem:[%s5034_s4] ss:$0 sm:$0xff] }
  0xa2   : > { %v1475_v33 = vadd.f32 %v1405_v38, %v1232_v10  ;;  %v5283_v1 = vrot.slane %v3627_v24, 2  ;;  %v654_v0 = vadd.f32 %v622_v22, %v555_v63  ;;  %v1488_v3 = vmul.f32 %v3781_v26, %v3396_v36  ;;  %v3949_v36 = vld [vmem:[%s5035_s5] ss:$0 sm:$0xff] }
  0xa3   : > { %v2233_v53 = vmul.f32 %v3941_v37, %v2197_v30  ;;  %v858_v49 = vrot.slane %v758_v54, 1  ;;  %v1101_v47 = vrot.slane %v1002_v59, 1  ;;  %v1344_v57 = vrot.slane %v1245_v27, 1  ;;  %v3967_v10 = vld [vmem:[%s2917_s20 + $0xa0] sm:$0x3]  ;;  %v5290_v27 = vld [vmem:[#allocation16_spill] sm:$0xff] }
  0xa4   : > { %v2135_v15 = vsel %vm1579_vm1, %v5283_v1, %v2134_v25  ;;  %v1719_v12 = vadd.f32 %v1649_v28, %v1475_v33  ;;  %v721_v55 = vadd.f32 %v689_v6, %v654_v0  ;;  %v1588_v24 = vrot.slane %v1488_v3, 2  ;;  %5288 = vst [vmem:[#allocation11_spill] sm:$0xff] %v3967_v10 }
  0xa5   : > { %v1732_v9 = vmul.f32 %v3797_v14, %v3404_v2  ;;  %v2269_v39 = vadd.f32 %v3949_v36, %v2233_v53  ;;  %v5284_v51 = vrot.slane %v3652_v8, 1  ;;  %v5285_v48 = vrot.slane %v3661_v35, 1 }
  0xa6   : > { %v5286_v38 = vrot.slane %v3669_v58, 1  ;;  %v1962_v2 = vadd.f32 %v1892_v44, %v1719_v12  ;;  %v5287_v50 = vrot.slane %v3682_v21, 2  ;;  %v1975_v8 = vmul.f32 %v3812_v19, %v3913_v17 }
  0xa7   : > { %v859_v61 = vsel %vm849_vm0, %v5284_v51, %v858_v49  ;;  %v1102_v18 = vsel %vm849_vm0, %v5285_v48, %v1101_v47  ;;  %v1831_v31 = vrot.slane %v1732_v9, 2  ;;  %v2301_v63 = vmax.f32 %v2269_v39, 0.0  ;;  %v5293_v9 = vld [vmem:[#allocation5_spill] sm:$0xff] }
  0xa8   : > { %v1345_v16 = vsel %vm849_vm0, %v5286_v38, %v1344_v57  ;;  %v965_v41 = vadd.f32 %v859_v61, %v721_v55  ;;  %v1589_v28 = vsel %vm1579_vm1, %v5287_v50, %v1588_v24  ;;  %v563_v35 = vmul.f32 %v3712_v56, %v3246_v5  ;;  %v5295_v61 = vld [vmem:[#allocation15_spill] sm:$0xff]  ;;  %v5297_v50 = vld [vmem:[#allocation6_spill] sm:$0xff] }
  0xa9   : > { %v630_v58 = vmul.f32 %v3723_v23, %v3259_v40  ;;  %v2205_v25 = vadd.f32 %v2135_v15, %v1962_v2  ;;  %v5289_v22 = vrot.slane %v3689_v32, 2  ;;  %v697_v6 = vmul.f32 %v3733_v34, %v3728_v13  ;;  %2407 = vmatmul.f32.gmra.mxu2 %v2301_v63  ;;  %v5291_v15 = vld [vmem:[#allocation3_spill] sm:$0xff] }
  0xaa   : > { %v1208_v44 = vadd.f32 %v1102_v18, %v965_v41  ;;  %v2074_v30 = vrot.slane %v1975_v8, 2  ;;  %v770_v59 = vmul.f32 %v3740_v46, %v3435_v7  ;;  %v1014_v5 = vmul.f32 %v3754_v4, %v5290_v27 }
  0xab   : > { %v1832_v21 = vsel %vm1579_vm1, %v5289_v22, %v1831_v31  ;;  %v662_v54 = vadd.f32 %v630_v58, %v563_v35  ;;  %v2241_v40 = vmul.f32 %v3941_v37, %v2205_v25  ;;  %v1257_v32 = vmul.f32 %v3766_v20, %v3967_v10  ;;  %v2758_v25 = vld [vmem:[%s2917_s20 + $0xd8] sm:$0xff] }
  0xac   : > { %v1451_v33 = vadd.f32 %v1345_v16, %v1208_v44  ;;  %v1500_v1 = vmul.f32 %v3781_v26, %v3435_v7  ;;  %v5292_v0 = vrot.slane %v5291_v15, 2  ;;  %v878_v49 = vrot.slane %v770_v59, 1 }
  0xad   : > { %v729_v53 = vadd.f32 %v697_v6, %v662_v54  ;;  %v1121_v47 = vrot.slane %v1014_v5, 1  ;;  %v2277_v57 = vadd.f32 %v3949_v36, %v2241_v40  ;;  %v1364_v55 = vrot.slane %v1257_v32, 1  ;;  %v4012_v54 = vld [vmem:[%s2917_s20 + $0x108] sm:$0xff] }
  0xae   : > { %v2075_v3 = vsel %vm1579_vm1, %v5292_v0, %v2074_v30  ;;  %v1695_v12 = vadd.f32 %v1589_v28, %v1451_v33  ;;  %v1608_v24 = vrot.slane %v1500_v1, 2  ;;  %v5294_v39 = vrot.slane %v5293_v9, 1  ;;  %v5300_v30 = vld [vmem:[#allocation12_spill] sm:$0xff]  ;;  %5301 = vst [vmem:[#allocation16_spill] sm:$0xff] %v4012_v54  ;;  %v5305_v1 = vld [vmem:[#allocation9_spill] sm:$0xff]  ;;  %v4077_v40 = vld [vmem:[%s2917_s20 + $0x168] sm:$0xff] }
  0xaf   : > { %v5296_v48 = vrot.slane %v5295_v61, 1  ;;  %v1744_v18 = vmul.f32 %v3797_v14, %v5290_v27  ;;  %v1987_v38 = vmul.f32 %v3812_v19, %v3967_v10  ;;  %v2309_v16 = vmax.f32 %v2277_v57, 0.0  ;;  %v5302_v27 = vld [vmem:[#allocation7_spill] sm:$0xff]  ;;  %5308 = vst [vmem:[#allocation5_spill] sm:$0xff] %v4077_v40 }
  0xb0   : > { %v879_v51 = vsel %vm849_vm0, %v5294_v39, %v878_v49  ;;  %v1938_v2 = vadd.f32 %v1832_v21, %v1695_v12  ;;  %v5298_v28 = vrot.slane %v5297_v50, 1  ;;  %v5299_v63 = vrot.slane %v3791_v62, 2  ;;  %v5306_v12 = vld [vmem:[#allocation13_spill] sm:$0xff] }
  0xb1   : > { %v1122_v7 = vsel %vm849_vm0, %v5296_v48, %v1121_v47  ;;  %v973_v41 = vadd.f32 %v879_v51, %v729_v53  ;;  %v1851_v35 = vrot.slane %v1744_v18, 2  ;;  %v2094_v58 = vrot.slane %v1987_v38, 2  ;;  %2431 = vmatmul.f32.gmra.mxu3 %v2309_v16 }
  0xb2   : > { %v1365_v31 = vsel %vm849_vm0, %v5298_v28, %v1364_v55  ;;  %v1609_v8 = vsel %vm1579_vm1, %v5299_v63, %v1608_v24  ;;  %v572_v44 = vmul.f32 %v2758_v25, %v3712_v56  ;;  %v2181_v22 = vadd.f32 %v2075_v3, %v1938_v2 }
  0xb3   : > { %v1216_v6 = vadd.f32 %v1122_v7, %v973_v41  ;;  %v639_v21 = vmul.f32 %v3723_v23, %v5300_v30  ;;  %v706_v59 = vmul.f32 %v4012_v54, %v3733_v34  ;;  %v5303_v62 = vrot.slane %v5302_v27, 2  ;;  %v4043_v7 = vld [vmem:[%s2917_s20 + $0x110] sm:$0xff] }
  0xb4   : > { %v2095_v33 = vsel %vm1579_vm1, %v2092_v45, %v2094_v58  ;;  %v783_v32 = vmul.f32 %v2758_v25, %v3740_v46  ;;  %v4025_v15 = vmul.f32 %v5305_v1, %v3740_v46  ;;  %v2217_v0 = vmul.f32 %v3941_v37, %v2181_v22  ;;  %5307 = vst [vmem:[#allocation3_spill] sm:$0xff] %v4043_v7 }
  0xb5   : > { %v1852_v5 = vsel %vm1579_vm1, %v5303_v62, %v1851_v35  ;;  %v1459_v3 = vadd.f32 %v1365_v31, %v1216_v6  ;;  %v671_v53 = vadd.f32 %v639_v21, %v572_v44  ;;  %v1027_v49 = vmul.f32 %v3754_v4, %v5300_v30 }
  0xb6   : > { %v900_v47 = vrot.slane %v783_v32, 1  ;;  %v5143_v57 = vrot.slane %v4025_v15, 1  ;;  %v4033_v45 = vmul.f32 %v3754_v4, %v5306_v12  ;;  %v1270_v55 = vmul.f32 %v4012_v54, %v3766_v20 }
  0xb7   : > { %v2253_v24 = vadd.f32 %v3949_v36, %v2217_v0  ;;  %v1703_v9 = vadd.f32 %v1609_v8, %v1459_v3  ;;  %v738_v39 = vadd.f32 %v706_v59, %v671_v53  ;;  %v1143_v51 = vrot.slane %v1027_v49, 1  ;;  %v2761_v0 = vld [vmem:[%s2917_s20 + $0x138] sm:$0xff]  ;;  %v5309_v53 = vld [vmem:[#allocation14_spill] sm:$0xff] }
  0xb8   : > { %v902_v61 = vsel %vm849_vm0, %v900_v47, %v5143_v57  ;;  %v5142_v48 = vrot.slane %v4033_v45, 1  ;;  %v4047_v18 = vmul.f32 %v4043_v7, %v3766_v20  ;;  %v1386_v38 = vrot.slane %v1270_v55, 1  ;;  %v5314_v57 = vld [vmem:[#allocation4_spill] sm:$0xff] }
  0xb9   : > { %v2285_v16 = vmax.f32 %v2253_v24, 0.0  ;;  %v1946_v2 = vadd.f32 %v1852_v5, %v1703_v9  ;;  %v982_v41 = vadd.f32 %v902_v61, %v738_v39  ;;  %v1513_v50 = vmul.f32 %v2758_v25, %v3781_v26  ;;  %v4092_v39 = vld [vmem:[%s2917_s20 + $0x170] sm:$0xff] }
  0xba   : > { %v1145_v28 = vsel %vm849_vm0, %v1143_v51, %v5142_v48  ;;  %v5137_v31 = vrot.slane %v4047_v18, 1  ;;  %v4056_v63 = vmul.f32 %v5305_v1, %v3781_v26  ;;  %v1757_v8 = vmul.f32 %v3797_v14, %v5300_v30 }
  0xbb   : > { %2359 = vmatmul.f32.gmra.mxu0 %v2285_v16  ;;  %v2189_v35 = vadd.f32 %v2095_v33, %v1946_v2  ;;  %v1225_v58 = vadd.f32 %v1145_v28, %v982_v41  ;;  %v1630_v44 = vrot.slane %v1513_v50, 2  ;;  %v4062_v25 = vmul.f32 %v3797_v14, %v5306_v12 }
  0xbc   : > { %v1388_v22 = vsel %vm849_vm0, %v1386_v38, %v5137_v31  ;;  %v5136_v6 = vrot.slane %v4056_v63, 2  ;;  %v1873_v21 = vrot.slane %v1757_v8, 2  ;;  %v2000_v30 = vmul.f32 %v4012_v54, %v3812_v19 }
  0xbd   : > { %v2225_v59 = vmul.f32 %v3941_v37, %v2189_v35  ;;  %v1468_v27 = vadd.f32 %v1388_v22, %v1225_v58  ;;  %v5135_v62 = vrot.slane %v4062_v25, 2  ;;  %v4074_v5 = vmul.f32 %v4043_v7, %v3812_v19 }
  0xbe   : > { %v1632_v33 = vsel %vm1579_vm1, %v1630_v44, %v5136_v6  ;;  %v2116_v32 = vrot.slane %v2000_v30, 2  ;;  %v580_v3 = vmul.f32 %v2761_v0, %v3712_v56  ;;  %v647_v49 = vmul.f32 %v3723_v23, %v5309_v53 }
  0xbf   : > { %v2261_v47 = vadd.f32 %v3949_v36, %v2225_v59  ;;  %v1712_v55 = vadd.f32 %v1632_v33, %v1468_v27  ;;  %v1875_v24 = vsel %vm1579_vm1, %v1873_v21, %v5135_v62  ;;  %v5134_v9 = vrot.slane %v4074_v5, 2 }
  0xc0   : > { %v679_v51 = vadd.f32 %v647_v49, %v580_v3  ;;  %v714_v61 = vmul.f32 %v3733_v34, %v4077_v40  ;;  %v795_v38 = vmul.f32 %v2761_v0, %v3740_v46  ;;  %v4099_v16 = vmul.f32 %v3881_v60, %v3740_v46 }
  0xc1   : > { %v2293_v2 = vmax.f32 %v2261_v47, 0.0  ;;  %v1955_v41 = vadd.f32 %v1875_v24, %v1712_v55  ;;  %v2118_v50 = vsel %vm1579_vm1, %v2116_v32, %v5134_v9  ;;  %v1039_v28 = vmul.f32 %v3754_v4, %v5309_v53 }
  0xc2   : > { %v746_v8 = vadd.f32 %v714_v61, %v679_v51  ;;  %v920_v35 = vrot.slane %v795_v38, 1  ;;  %v5132_v58 = vrot.slane %v4099_v16, 1  ;;  %v4109_v44 = vmul.f32 %v3754_v4, %v3573_v52 }
  0xc3   : > { %2383 = vmatmul.f32.gmra.mxu1 %v2293_v2  ;;  %v2198_v22 = vadd.f32 %v2118_v50, %v1955_v41  ;;  %v1163_v21 = vrot.slane %v1039_v28, 1  ;;  %v1282_v30 = vmul.f32 %v3766_v20, %v4077_v40  ;;  %v4115_v59 = vmul.f32 %v3766_v20, %v4092_v39 }
  0xc4   : > { %v922_v27 = vsel %vm849_vm0, %v920_v35, %v5132_v58  ;;  %v5131_v33 = vrot.slane %v4109_v44, 1  ;;  %v1525_v32 = vmul.f32 %v2761_v0, %v3781_v26  ;;  %v4124_v3 = vmul.f32 %v3881_v60, %v3781_v26 }
  0xc5   : > { %v2234_v49 = vmul.f32 %v3941_v37, %v2198_v22  ;;  %v990_v47 = vadd.f32 %v922_v27, %v746_v8  ;;  %v1406_v55 = vrot.slane %v1282_v30, 1  ;;  %v5130_v24 = vrot.slane %v4115_v59, 1 }
  0xc6   : > { %v1165_v51 = vsel %vm849_vm0, %v1163_v21, %v5131_v33  ;;  %v1650_v61 = vrot.slane %v1525_v32, 2  ;;  %v5129_v38 = vrot.slane %v4124_v3, 2  ;;  %v1769_v0 = vmul.f32 %v3797_v14, %v5309_v53  ;;  %v2762_v32 = vld [vmem:[%s2917_s20 + $0x18] sm:$0xff] }
  0xc7   : > { %v2270_v2 = vadd.f32 %v3949_v36, %v2234_v49  ;;  %v1233_v41 = vadd.f32 %v1165_v51, %v990_v47  ;;  %v1408_v50 = vsel %vm849_vm0, %v1406_v55, %v5130_v24  ;;  %v4140_v28 = vmul.f32 %v3797_v14, %v3573_v52  ;;  %v5310_v51 = vld [vmem:[#allocation2_spill] sm:$0xff] }
  0xc8   : > { %v1652_v8 = vsel %vm1579_vm1, %v1650_v61, %v5129_v38  ;;  %v1893_v35 = vrot.slane %v1769_v0, 2  ;;  %v2012_v53 = vmul.f32 %v3812_v19, %v4077_v40  ;;  %v4149_v22 = vmul.f32 %v3812_v19, %v4092_v39  ;;  %v4158_v0 = vld [vmem:[%s2917_s20 + $0x48] sm:$0xff] }
  0xc9   : > { %v2302_v21 = vmax.f32 %v2270_v2, 0.0  ;;  %v1476_v30 = vadd.f32 %v1408_v50, %v1233_v41  ;;  %v5133_v27 = vrot.slane %v4140_v28, 2  ;;  %v556_v49 = vmul.f32 %v2762_v32, %v3712_v56  ;;  %5311 = vst [vmem:[#allocation15_spill] sm:$0xff] %v4158_v0  ;;  %v4167_v50 = vld [vmem:[%s2917_s20 + $0x20] sm:$0xff] }
  0xca   : > { %v2136_v47 = vrot.slane %v2012_v53, 2  ;;  %v5138_v55 = vrot.slane %v4149_v22, 2  ;;  %v623_v61 = vmul.f32 %v3723_v23, %v5310_v51  ;;  %v690_v38 = vmul.f32 %v4158_v0, %v3733_v34 }
  0xcb   : > { %2410 = vmatmul.f32.gmra.mxu2 %v2302_v21  ;;  %v1720_v24 = vadd.f32 %v1652_v8, %v1476_v30  ;;  %v1895_v2 = vsel %vm1579_vm1, %v1893_v35, %v5133_v27  ;;  %v759_v41 = vmul.f32 %v2762_v32, %v3740_v46  ;;  %v4171_v53 = vmul.f32 %v4167_v50, %v3740_v46 }
  0xcc   : > { %v2138_v33 = vsel %vm1579_vm1, %v2136_v47, %v5138_v55  ;;  %v655_v58 = vadd.f32 %v623_v61, %v556_v49  ;;  %v1003_v8 = vmul.f32 %v3754_v4, %v5310_v51  ;;  %v4180_v21 = vmul.f32 %v3754_v4, %v3644_v42  ;;  %v4187_v47 = vld [vmem:[%s2917_s20 + $0x50] sm:$0xff] }
  0xcd   : > { %v1963_v35 = vadd.f32 %v1895_v2, %v1720_v24  ;;  %v860_v30 = vrot.slane %v759_v41, 1  ;;  %v5141_v27 = vrot.slane %v4171_v53, 1  ;;  %v1246_v9 = vmul.f32 %v4158_v0, %v3766_v20 }
  0xce   : > { %v722_v62 = vadd.f32 %v690_v38, %v655_v58  ;;  %v1103_v6 = vrot.slane %v1003_v8, 1  ;;  %v5139_v31 = vrot.slane %v4180_v21, 1  ;;  %v4191_v49 = vmul.f32 %v4187_v47, %v3766_v20 }
  0xcf   : > { %v2206_v61 = vadd.f32 %v2138_v33, %v1963_v35  ;;  %v862_v24 = vsel %vm849_vm0, %v860_v30, %v5141_v27  ;;  %v1346_v2 = vrot.slane %v1246_v9, 1  ;;  %v1489_v41 = vmul.f32 %v2762_v32, %v3781_v26 }
  0xd0   : > { %v966_v55 = vadd.f32 %v862_v24, %v722_v62  ;;  %v1105_v58 = vsel %vm849_vm0, %v1103_v6, %v5139_v31  ;;  %v5140_v38 = vrot.slane %v4191_v49, 1  ;;  %v4203_v8 = vmul.f32 %v4167_v50, %v3781_v26 }
  0xd1   : > { %v2242_v33 = vmul.f32 %v3941_v37, %v2206_v61  ;;  %v1590_v35 = vrot.slane %v1489_v41, 2  ;;  %v1733_v9 = vmul.f32 %v3797_v14, %v5310_v51  ;;  %v4210_v62 = vmul.f32 %v3797_v14, %v3644_v42 }
  0xd2   : > { %v1209_v32 = vadd.f32 %v1105_v58, %v966_v55  ;;  %v1348_v6 = vsel %vm849_vm0, %v1346_v2, %v5140_v38  ;;  %v5149_v30 = vrot.slane %v4203_v8, 2  ;;  %v1976_v24 = vmul.f32 %v4158_v0, %v3812_v19  ;;  %v2766_v38 = vld [vmem:[%s2917_s20 + $0x78] sm:$0xff] }
  0xd3   : > { %5312 = vst [vmem:[#allocation6_spill] sm:$0xff] %v4210_v62  ;;  %v2278_v61 = vadd.f32 %v3949_v36, %v2242_v33  ;;  %v1833_v41 = vrot.slane %v1733_v9, 2  ;;  %v5148_v51 = vrot.slane %v4210_v62, 2  ;;  %v4222_v31 = vmul.f32 %v4187_v47, %v3812_v19 }
  0xd4   : > { %v1452_v55 = vadd.f32 %v1348_v6, %v1209_v32  ;;  %v1592_v2 = vsel %vm1579_vm1, %v1590_v35, %v5149_v30  ;;  %v2076_v58 = vrot.slane %v1976_v24, 2  ;;  %v564_v27 = vmul.f32 %v2766_v38, %v3712_v56  ;;  %v4236_v32 = vld [vmem:[%s2917_s20 + $0xa8] sm:$0xff]  ;;  %v4242_v24 = vld [vmem:[%s2917_s20 + $0x80] sm:$0xff] }
  0xd5   : > { %5313 = vst [vmem:[#allocation12_spill] sm:$0xff] %v4222_v31  ;;  %v2310_v48 = vmax.f32 %v2278_v61, 0.0  ;;  %v1835_v33 = vsel %vm1579_vm1, %v1833_v41, %v5148_v51  ;;  %v5158_v9 = vrot.slane %v4222_v31, 2  ;;  %v631_v0 = vmul.f32 %v3723_v23, %v5314_v57 }
  0xd6   : > { %v1696_v40 = vadd.f32 %v1592_v2, %v1452_v55  ;;  %5315 = vst [vmem:[#allocation7_spill] sm:$0xff] %v4236_v32  ;;  %v698_v35 = vmul.f32 %v4236_v32, %v3733_v34  ;;  %v771_v6 = vmul.f32 %v2766_v38, %v3740_v46  ;;  %v4246_v61 = vmul.f32 %v4242_v24, %v3740_v46 }
  0xd7   : > { %2434 = vmatmul.f32.gmra.mxu3 %v2310_v48  ;;  %v2078_v41 = vsel %vm1579_vm1, %v2076_v58, %v5158_v9  ;;  %v663_v55 = vadd.f32 %v631_v0, %v564_v27  ;;  %v1015_v2 = vmul.f32 %v3754_v4, %v5314_v57  ;;  %v4255_v51 = vmul.f32 %v3754_v4, %v3728_v13  ;;  %v4262_v58 = vld [vmem:[%s2917_s20 + $0xb0] sm:$0xff] }
  0xd8   : > { %v1939_v30 = vadd.f32 %v1835_v33, %v1696_v40  ;;  %v880_v11 = vrot.slane %v771_v6, 1  ;;  %v5161_v54 = vrot.slane %v4246_v61, 1  ;;  %v1258_v10 = vmul.f32 %v4236_v32, %v3766_v20 }
  0xd9   : > { %v730_v48 = vadd.f32 %v698_v35, %v663_v55  ;;  %v1123_v62 = vrot.slane %v1015_v2, 1  ;;  %v5159_v31 = vrot.slane %v4255_v51, 1  ;;  %v4266_v27 = vmul.f32 %v4262_v58, %v3766_v20 }
  0xda   : > { %v2182_v0 = vadd.f32 %v2078_v41, %v1939_v30  ;;  %v882_v40 = vsel %vm849_vm0, %v880_v11, %v5161_v54  ;;  %v1366_v33 = vrot.slane %v1258_v10, 1  ;;  %v1501_v6 = vmul.f32 %v2766_v38, %v3781_v26 }
  0xdb   : > { %v974_v9 = vadd.f32 %v882_v40, %v730_v48  ;;  %v1125_v35 = vsel %vm849_vm0, %v1123_v62, %v5159_v31  ;;  %v5160_v55 = vrot.slane %v4266_v27, 1  ;;  %v4278_v2 = vmul.f32 %v4242_v24, %v3781_v26 }
  0xdc   : > { %v2218_v30 = vmul.f32 %v3941_v37, %v2182_v0  ;;  %v1610_v41 = vrot.slane %v1501_v6, 2  ;;  %v1745_v11 = vmul.f32 %v3797_v14, %v5314_v57  ;;  %v4285_v10 = vmul.f32 %v3797_v14, %v3728_v13 }
  0xdd   : > { %5316 = vst [vmem:[#allocation8_spill] sm:$0xff] %v4278_v2  ;;  %v1217_v38 = vadd.f32 %v1125_v35, %v974_v9  ;;  %v1368_v62 = vsel %vm849_vm0, %v1366_v33, %v5160_v55  ;;  %v5166_v48 = vrot.slane %v4278_v2, 2  ;;  %v1988_v40 = vmul.f32 %v4236_v32, %v3812_v19  ;;  %v2770_v2 = vld [vmem:[%s2917_s20 + $0xe8] sm:$0x3] }
  0xde   : > { %5317 = vst [vmem:[#allocation9_spill] sm:$0xff] %v4285_v10  ;;  %v2254_v0 = vadd.f32 %v3949_v36, %v2218_v30  ;;  %v1853_v6 = vrot.slane %v1745_v11, 2  ;;  %v5165_v57 = vrot.slane %v4285_v10, 2  ;;  %v4297_v31 = vmul.f32 %v4262_v58, %v3812_v19 }
  0xdf   : > { %v1460_v9 = vadd.f32 %v1368_v62, %v1217_v38  ;;  %v1612_v33 = vsel %vm1579_vm1, %v1610_v41, %v5166_v48  ;;  %v2096_v35 = vrot.slane %v1988_v40, 2  ;;  %v573_v55 = vmul.f32 %v5305_v1, %v3712_v56 }
  0xe0   : > { %5318 = vst [vmem:[#allocation13_spill] sm:$0xff] %v4297_v31  ;;  %v2286_v54 = vmax.f32 %v2254_v0, 0.0  ;;  %v1855_v30 = vsel %vm1579_vm1, %v1853_v6, %v5165_v57  ;;  %v5171_v11 = vrot.slane %v4297_v31, 2  ;;  %v640_v32 = vmul.f32 %v3723_v23, %v5306_v12  ;;  %v4320_v6 = vld [vmem:[%s2917_s20 + $0x118] sm:$0x3] }
  0xe1   : > { %v1704_v38 = vadd.f32 %v1612_v33, %v1460_v9  ;;  %v707_v62 = vmul.f32 %v4043_v7, %v3733_v34  ;;  %v785_v41 = vmul.f32 %v2770_v2, %v3740_v46  ;;  %v1029_v1 = vmul.f32 %v3754_v4, %v3826_v29 }
  0xe2   : > { %2362 = vmatmul.f32.gmra.mxu0 %v2286_v54  ;;  %v2098_v40 = vsel %vm1579_vm1, %v2096_v35, %v5171_v11  ;;  %v672_v0 = vadd.f32 %v640_v32, %v573_v55  ;;  %v1272_v12 = vmul.f32 %v4320_v6, %v3766_v20  ;;  %v1515_v9 = vmul.f32 %v2770_v2, %v3781_v26 }
  0xe3   : > { %v1947_v33 = vadd.f32 %v1855_v30, %v1704_v38  ;;  %v903_v57 = vrot.slane %v785_v41, 1  ;;  %v1146_v48 = vrot.slane %v1029_v1, 1  ;;  %v1759_v7 = vmul.f32 %v3797_v14, %v3826_v29 }
  0xe4   : > { %v739_v54 = vadd.f32 %v707_v62, %v672_v0  ;;  %v1389_v10 = vrot.slane %v1272_v12, 1  ;;  %v1633_v31 = vrot.slane %v1515_v9, 2  ;;  %v2002_v32 = vmul.f32 %v4320_v6, %v3812_v19  ;;  %v4342_v12 = vld [vmem:[%s2917_s20 + $0x178] sm:$0x3] }
  0xe5   : > { %v2190_v55 = vadd.f32 %v2098_v40, %v1947_v33  ;;  %v5319_v35 = vrot.slane %v4025_v15, 1  ;;  %v5320_v2 = vrot.slane %v4033_v45, 1  ;;  %v1876_v38 = vrot.slane %v1759_v7, 2 }
  0xe6   : > { %v5321_v29 = vrot.slane %v4047_v18, 1  ;;  %v5322_v1 = vrot.slane %v4056_v63, 2  ;;  %v2119_v40 = vrot.slane %v2002_v32, 2  ;;  %v581_v7 = vmul.f32 %v3881_v60, %v3712_v56 }
  0xe7   : > { %v904_v11 = vsel %vm849_vm0, %v5319_v35, %v903_v57  ;;  %v1147_v30 = vsel %vm849_vm0, %v5320_v2, %v1146_v48  ;;  %v2226_v15 = vmul.f32 %v3941_v37, %v2190_v55  ;;  %v5323_v57 = vrot.slane %v4062_v25, 2 }
  0xe8   : > { %v983_v41 = vadd.f32 %v904_v11, %v739_v54  ;;  %v1390_v62 = vsel %vm849_vm0, %v5321_v29, %v1389_v10  ;;  %v1634_v0 = vsel %vm1579_vm1, %v5322_v1, %v1633_v31  ;;  %v648_v18 = vmul.f32 %v3723_v23, %v3573_v52  ;;  %v2772_v11 = vld [vmem:[%s2917_s20 + $0x148] sm:$0x3] }
  0xe9   : > { %v1877_v45 = vsel %vm1579_vm1, %v5323_v57, %v1876_v38  ;;  %v5324_v63 = vrot.slane %v4074_v5, 2  ;;  %v715_v48 = vmul.f32 %v3733_v34, %v4092_v39  ;;  %v797_v9 = vmul.f32 %v2772_v11, %v3740_v46 }
  0xea   : > { %v1226_v10 = vadd.f32 %v1147_v30, %v983_v41  ;;  %v2262_v25 = vadd.f32 %v3949_v36, %v2226_v15  ;;  %v680_v33 = vadd.f32 %v648_v18, %v581_v7  ;;  %v1041_v60 = vmul.f32 %v3754_v4, %v3869_v43 }
  0xeb   : > { %v2120_v31 = vsel %vm1579_vm1, %v5324_v63, %v2119_v40  ;;  %v1284_v52 = vmul.f32 %v3766_v20, %v4342_v12  ;;  %v923_v32 = vrot.slane %v797_v9, 1  ;;  %v1527_v5 = vmul.f32 %v2772_v11, %v3781_v26 }
  0xec   : > { %v1469_v54 = vadd.f32 %v1390_v62, %v1226_v10  ;;  %v1771_v55 = vmul.f32 %v3797_v14, %v3869_v43  ;;  %v2294_v35 = vmax.f32 %v2262_v25, 0.0  ;;  %v747_v2 = vadd.f32 %v715_v48, %v680_v33 }
  0xed   : > { %v1166_v30 = vrot.slane %v1041_v60, 1  ;;  %v1409_v38 = vrot.slane %v1284_v52, 1  ;;  %v5325_v29 = vrot.slane %v4099_v16, 1  ;;  %v1653_v40 = vrot.slane %v1527_v5, 2  ;;  %v2773_v60 = vld [vmem:[%s2917_s20 + $0x28] sm:$0x3] }
  0xee   : > { %v1713_v41 = vadd.f32 %v1634_v0, %v1469_v54  ;;  %v1896_v15 = vrot.slane %v1771_v55, 2  ;;  %2386 = vmatmul.f32.gmra.mxu1 %v2294_v35  ;;  %v5326_v57 = vrot.slane %v4109_v44, 1  ;;  %v5327_v43 = vrot.slane %v4115_v59, 1  ;;  %v4395_v52 = vld [vmem:[%s2917_s20 + $0x58] sm:$0x3] }
  0xef   : > { %v924_v1 = vsel %vm849_vm0, %v5325_v29, %v923_v32  ;;  %v2014_v0 = vmul.f32 %v3812_v19, %v4342_v12  ;;  %v5328_v10 = vrot.slane %v4124_v3, 2  ;;  %v5329_v48 = vrot.slane %v4140_v28, 2 }
  0xf0   : > { %v991_v62 = vadd.f32 %v924_v1, %v747_v2  ;;  %v1167_v7 = vsel %vm849_vm0, %v5326_v57, %v1166_v30  ;;  %v1410_v18 = vsel %vm849_vm0, %v5327_v43, %v1409_v38  ;;  %v1956_v16 = vadd.f32 %v1877_v45, %v1713_v41 }
  0xf1   : > { %v1654_v63 = vsel %vm1579_vm1, %v5328_v10, %v1653_v40  ;;  %v1897_v11 = vsel %vm1579_vm1, %v5329_v48, %v1896_v15  ;;  %v557_v44 = vmul.f32 %v4167_v50, %v3712_v56  ;;  %v2139_v25 = vrot.slane %v2014_v0, 2 }
  0xf2   : > { %v1234_v9 = vadd.f32 %v1167_v7, %v991_v62  ;;  %v624_v59 = vmul.f32 %v3723_v23, %v3644_v42  ;;  %v691_v33 = vmul.f32 %v4187_v47, %v3733_v34  ;;  %v2199_v45 = vadd.f32 %v2120_v31, %v1956_v16 }
  0xf3   : > { %v761_v3 = vmul.f32 %v2773_v60, %v3740_v46  ;;  %v1005_v28 = vmul.f32 %v3754_v4, %v3913_v17  ;;  %v1248_v50 = vmul.f32 %v4395_v52, %v3766_v20  ;;  %v5330_v32 = vrot.slane %v4149_v22, 2 }
  0xf4   : > { %v1477_v54 = vadd.f32 %v1410_v18, %v1234_v9  ;;  %v656_v5 = vadd.f32 %v624_v59, %v557_v44  ;;  %v1491_v55 = vmul.f32 %v2773_v60, %v3781_v26  ;;  %v2235_v31 = vmul.f32 %v3941_v37, %v2199_v45  ;;  %v2775_v45 = vld [vmem:[%s2917_s20 + $0x88] sm:$0x3] }
  0xf5   : > { %v2140_v42 = vsel %vm1579_vm1, %v5330_v32, %v2139_v25  ;;  %v863_v35 = vrot.slane %v761_v3, 1  ;;  %v1106_v2 = vrot.slane %v1005_v28, 1  ;;  %v1349_v30 = vrot.slane %v1248_v50, 1  ;;  %v5337_v3 = vld [vmem:[#allocation11_spill] sm:$0xff]  ;;  %v4436_v50 = vld [vmem:[%s2917_s20 + $0xb8] sm:$0x3] }
  0xf6   : > { %v1721_v38 = vadd.f32 %v1654_v63, %v1477_v54  ;;  %v723_v41 = vadd.f32 %v691_v33, %v656_v5  ;;  %v1593_v29 = vrot.slane %v1491_v55, 2  ;;  %v1735_v1 = vmul.f32 %v3797_v14, %v3913_v17  ;;  %5338 = vst [vmem:[#allocation14_spill] sm:$0xff] %v4436_v50 }
  0xf7   : > { %v2271_v40 = vadd.f32 %v3949_v36, %v2235_v31  ;;  %v5331_v22 = vrot.slane %v4171_v53, 1  ;;  %v5332_v62 = vrot.slane %v4180_v21, 1  ;;  %v5333_v7 = vrot.slane %v4191_v49, 1 }
  0xf8   : > { %v1964_v18 = vadd.f32 %v1897_v11, %v1721_v38  ;;  %v5334_v16 = vrot.slane %v4203_v8, 2  ;;  %v1836_v10 = vrot.slane %v1735_v1, 2  ;;  %v1978_v53 = vmul.f32 %v4395_v52, %v3812_v19  ;;  %v5335_v11 = vld [vmem:[#allocation6_spill] sm:$0xff] }
  0xf9   : > { %v864_v15 = vsel %vm849_vm0, %v5331_v22, %v863_v35  ;;  %v1107_v57 = vsel %vm849_vm0, %v5332_v62, %v1106_v2  ;;  %v1350_v43 = vsel %vm849_vm0, %v5333_v7, %v1349_v30  ;;  %v2303_v63 = vmax.f32 %v2271_v40, 0.0 }
  0xfa   : > { %v967_v0 = vadd.f32 %v864_v15, %v723_v41  ;;  %v1594_v17 = vsel %vm1579_vm1, %v5334_v16, %v1593_v29  ;;  %v565_v21 = vmul.f32 %v4242_v24, %v3712_v56  ;;  %v632_v49 = vmul.f32 %v3723_v23, %v3728_v13  ;;  %v5344_v16 = vld [vmem:[#allocation8_spill] sm:$0xff] }
  0xfb   : > { %v2207_v48 = vadd.f32 %v2140_v42, %v1964_v18  ;;  %v5336_v9 = vrot.slane %v5335_v11, 2  ;;  %v699_v25 = vmul.f32 %v4262_v58, %v3733_v34  ;;  %2413 = vmatmul.f32.gmra.mxu2 %v2303_v63  ;;  %v2079_v59 = vrot.slane %v1978_v53, 2  ;;  %v5339_v42 = vld [vmem:[#allocation12_spill] sm:$0xff] }
  0xfc   : > { %v1210_v44 = vadd.f32 %v1107_v57, %v967_v0  ;;  %v664_v33 = vadd.f32 %v632_v49, %v565_v21  ;;  %v773_v60 = vmul.f32 %v2775_v45, %v3740_v46  ;;  %v1017_v24 = vmul.f32 %v3754_v4, %v5337_v3  ;;  %v2777_v53 = vld [vmem:[%s2917_s20 + $0xf0] sm:$0xff] }
  0xfd   : > { %v1837_v8 = vsel %vm1579_vm1, %v5336_v9, %v1836_v10  ;;  %v2243_v13 = vmul.f32 %v3941_v37, %v2207_v48  ;;  %v1260_v54 = vmul.f32 %v4436_v50, %v3766_v20  ;;  %v1503_v32 = vmul.f32 %v2775_v45, %v3781_v26  ;;  %v2778_v9 = vld [vmem:[%s2917_s20 + $0x120] sm:$0xff] }
  0xfe   : > { %v1453_v28 = vadd.f32 %v1350_v43, %v1210_v44  ;;  %v5340_v5 = vrot.slane %v5339_v42, 2  ;;  %v731_v31 = vadd.f32 %v699_v25, %v664_v33  ;;  %v883_v35 = vrot.slane %v773_v60, 1  ;;  %v5346_v44 = vld [vmem:[#allocation16_spill] sm:$0xff]  ;;  %v5349_v33 = vld [vmem:[#allocation13_spill] sm:$0xff]  ;;  %v5351_v42 = vld [vmem:[#allocation3_spill] sm:$0xff] }
  0xff   : > { %v1126_v2 = vrot.slane %v1017_v24, 1  ;;  %v2279_v30 = vadd.f32 %v3949_v36, %v2243_v13  ;;  %v1369_v41 = vrot.slane %v1260_v54, 1  ;;  %v1613_v29 = vrot.slane %v1503_v32, 2 }
 0x100   : > { %v2080_v55 = vsel %vm1579_vm1, %v5340_v5, %v2079_v59  ;;  %v1697_v38 = vadd.f32 %v1594_v17, %v1453_v28  ;;  %v5341_v1 = vrot.slane %v4246_v61, 1  ;;  %v5342_v22 = vrot.slane %v4255_v51, 1 }
 0x101   : > { %v1747_v62 = vmul.f32 %v3797_v14, %v5337_v3  ;;  %v1990_v57 = vmul.f32 %v4436_v50, %v3812_v19  ;;  %v2311_v7 = vmax.f32 %v2279_v30, 0.0  ;;  %v5343_v0 = vrot.slane %v4266_v27, 1  ;;  %v4760_v50 = vld [vmem:[%s5034_s4] ss:$0 sm:$0xff] }
 0x102   : > { %v884_v40 = vsel %vm849_vm0, %v5341_v1, %v883_v35  ;;  %v1127_v15 = vsel %vm849_vm0, %v5342_v22, %v1126_v2  ;;  %v1940_v43 = vadd.f32 %v1837_v8, %v1697_v38  ;;  %v5345_v17 = vrot.slane %v5344_v16, 2  ;;  %v5347_v8 = vld [vmem:[#allocation9_spill] sm:$0xff] }
 0x103   : > { %v975_v18 = vadd.f32 %v884_v40, %v731_v31  ;;  %v1370_v61 = vsel %vm849_vm0, %v5343_v0, %v1369_v41  ;;  %v1856_v10 = vrot.slane %v1747_v62, 2  ;;  %v2099_v63 = vrot.slane %v1990_v57, 2  ;;  %2437 = vmatmul.f32.gmra.mxu3 %v2311_v7  ;;  %v5352_v41 = vld [vmem:[#allocation10_spill] sm:$0xff] }
 0x104   : > { %v1614_v51 = vsel %vm1579_vm1, %v5345_v17, %v1613_v29  ;;  %v574_v21 = vmul.f32 %v2777_v53, %v3712_v56  ;;  %v2183_v49 = vadd.f32 %v2080_v55, %v1940_v43  ;;  %v641_v11 = vmul.f32 %v5346_v44, %v3723_v23  ;;  %v4475_v56 = vld [vmem:[%s2917_s20 + $0xf8] sm:$0xff] }
 0x105   : > { %v1218_v48 = vadd.f32 %v1127_v15, %v975_v18  ;;  %v708_v27 = vmul.f32 %v2778_v9, %v3733_v34  ;;  %v5348_v25 = vrot.slane %v5347_v8, 2  ;;  %v5350_v45 = vrot.slane %v5349_v33, 2 }
 0x106   : > { %v786_v3 = vmul.f32 %v2777_v53, %v3740_v46  ;;  %v4479_v24 = vmul.f32 %v4475_v56, %v3740_v46  ;;  %v2219_v23 = vmul.f32 %v3941_v37, %v2183_v49  ;;  %v673_v34 = vadd.f32 %v641_v11, %v574_v21 }
 0x107   : > { %v1857_v59 = vsel %vm1579_vm1, %v5348_v25, %v1856_v10  ;;  %v2100_v60 = vsel %vm1579_vm1, %v5350_v45, %v2099_v63  ;;  %v1461_v13 = vadd.f32 %v1370_v61, %v1218_v48  ;;  %v1030_v28 = vmul.f32 %v5346_v44, %v3754_v4  ;;  %v4531_v48 = vld [vmem:[%s5033_s3] ss:$0 sm:$0xff] }
 0x108   : > { %v905_v54 = vrot.slane %v786_v3, 1  ;;  %v5189_v32 = vrot.slane %v4479_v24, 1  ;;  %v4487_v5 = vmul.f32 %v5351_v42, %v3754_v4  ;;  %v1273_v55 = vmul.f32 %v2778_v9, %v3766_v20 }
 0x109   : > { %v2255_v31 = vadd.f32 %v3949_v36, %v2219_v23  ;;  %v1705_v46 = vadd.f32 %v1614_v51, %v1461_v13  ;;  %v740_v35 = vadd.f32 %v708_v27, %v673_v34  ;;  %v1148_v2 = vrot.slane %v1030_v28, 1  ;;  %v4558_v23 = vld [vmem:[%s5033_s3 + $0x1] ss:$0 sm:$0xff]  ;;  %v4562_v34 = vld [vmem:[%s2917_s20 + $0x158] sm:$0xff] }
 0x10a   : > { %v907_v30 = vsel %vm849_vm0, %v905_v54, %v5189_v32  ;;  %v5186_v38 = vrot.slane %v4487_v5, 1  ;;  %v4497_v29 = vmul.f32 %v5352_v41, %v3766_v20  ;;  %v1391_v1 = vrot.slane %v1273_v55, 1 }
 0x10b   : > { %v2287_v4 = vmax.f32 %v2255_v31, 0.0  ;;  %v1948_v40 = vadd.f32 %v1857_v59, %v1705_v46  ;;  %v984_v22 = vadd.f32 %v907_v30, %v740_v35  ;;  %v1516_v15 = vmul.f32 %v2777_v53, %v3781_v26  ;;  %v4574_v46 = vld [vmem:[%s5033_s3 + $0x4] ss:$0 sm:$0xff] }
 0x10c   : > { %v1150_v62 = vsel %vm849_vm0, %v1148_v2, %v5186_v38  ;;  %v5185_v57 = vrot.slane %v4497_v29, 1  ;;  %v4506_v7 = vmul.f32 %v4475_v56, %v3781_v26  ;;  %v1760_v20 = vmul.f32 %v5346_v44, %v3797_v14  ;;  %v2781_v44 = vld [vmem:[%s2917_s20 + $0x150] sm:$0xff] }
 0x10d   : > { %2365 = vmatmul.f32.gmra.mxu0 %v2287_v4  ;;  %v2191_v43 = vadd.f32 %v2100_v60, %v1948_v40  ;;  %v1227_v18 = vadd.f32 %v1150_v62, %v984_v22  ;;  %v1635_v0 = vrot.slane %v1516_v15, 2  ;;  %v4512_v61 = vmul.f32 %v5351_v42, %v3797_v14  ;;  %v4550_v60 = vld [vmem:[%s5033_s3 + $0x6] ss:$0 sm:$0xff]  ;;  %v4587_v22 = vld [vmem:[%s5033_s3 + $0x7] ss:$0 sm:$0xff] }
 0x10e   : > { %v1393_v16 = vsel %vm849_vm0, %v1391_v1, %v5185_v57  ;;  %v5184_v17 = vrot.slane %v4506_v7, 2  ;;  %v1878_v26 = vrot.slane %v1760_v20, 2  ;;  %v2003_v51 = vmul.f32 %v2778_v9, %v3812_v19  ;;  %v4538_v9 = vld [vmem:[%s5033_s3 + $0x3] ss:$0 sm:$0xff]  ;;  %v4595_v62 = vld [vmem:[%s5033_s3 + $0x2] ss:$0 sm:$0xff] }
 0x10f   : > { %v2227_v10 = vmul.f32 %v3941_v37, %v2191_v43  ;;  %v1470_v63 = vadd.f32 %v1393_v16, %v1227_v18  ;;  %v5183_v53 = vrot.slane %v4512_v61, 2  ;;  %v4523_v21 = vmul.f32 %v5352_v41, %v3812_v19  ;;  %v5353_v19 = vld [vmem:[#allocation5_spill] sm:$0xff]  ;;  %v4609_v16 = vld [vmem:[%s5033_s3 + $0x5] ss:$0 sm:$0xff] }
 0x110   : > { %v1637_v14 = vsel %vm1579_vm1, %v1635_v0, %v5184_v17  ;;  %v2121_v49 = vrot.slane %v2003_v51, 2  ;;  %v582_v11 = vmul.f32 %v2781_v44, %v4531_v48  ;;  %v649_v27 = vmul.f32 %v4538_v9, %v5353_v19 }
 0x111   : > { %v2263_v8 = vadd.f32 %v3949_v36, %v2227_v10  ;;  %v1714_v25 = vadd.f32 %v1637_v14, %v1470_v63  ;;  %v1880_v59 = vsel %vm1579_vm1, %v1878_v26, %v5183_v53  ;;  %v5178_v33 = vrot.slane %v4523_v21, 2 }
 0x112   : > { %v681_v45 = vadd.f32 %v649_v27, %v582_v11  ;;  %v4553_v3 = vmul.f32 0.0, %v4550_v60  ;;  %v798_v13 = vmul.f32 %v4558_v23, %v2781_v44  ;;  %v4566_v28 = vmul.f32 %v4562_v34, %v4558_v23 }
 0x113   : > { %v2295_v54 = vmax.f32 %v2263_v8, 0.0  ;;  %v1957_v55 = vadd.f32 %v1880_v59, %v1714_v25  ;;  %v2123_v31 = vsel %vm1579_vm1, %v2121_v49, %v5178_v33  ;;  %v1042_v35 = vmul.f32 %v4574_v46, %v5353_v19  ;;  %v4627_v25 = vld [vmem:[%s5033_s3 + $0x8] ss:$0 sm:$0xff] }
 0x114   : > { %v748_v2 = vadd.f32 %v4553_v3, %v681_v45  ;;  %v925_v30 = vrot.slane %v798_v13, 1  ;;  %v5176_v41 = vrot.slane %v4566_v28, 1  ;;  %v4582_v1 = vmul.f32 %v4574_v46, %v4092_v39  ;;  %v2791_v45 = vld [vmem:[%s2917_s20 + $0x30] sm:$0xff] }
 0x115   : > { %2389 = vmatmul.f32.gmra.mxu1 %v2295_v54  ;;  %v2200_v4 = vadd.f32 %v2123_v31, %v1957_v55  ;;  %v1168_v40 = vrot.slane %v1042_v35, 1  ;;  %v4590_v15 = vmul.f32 0.0, %v4587_v22  ;;  %v1528_v20 = vmul.f32 %v4595_v62, %v2781_v44  ;;  %v5355_v31 = vld [vmem:[#allocation15_spill] sm:$0xff] }
 0x116   : > { %v927_v43 = vsel %vm849_vm0, %v925_v30, %v5176_v41  ;;  %v5175_v18 = vrot.slane %v4582_v1, 1  ;;  %v4604_v0 = vmul.f32 %v4595_v62, %v4562_v34  ;;  %v1772_v26 = vmul.f32 %v4609_v16, %v5353_v19 }
 0x117   : > { %v2236_v51 = vmul.f32 %v3941_v37, %v2200_v4  ;;  %v992_v10 = vadd.f32 %v927_v43, %v748_v2  ;;  %v5172_v63 = vrot.slane %v4590_v15, 1  ;;  %v1655_v14 = vrot.slane %v1528_v20, 2  ;;  %v2792_v2 = vld [vmem:[%s2917_s20 + $0x60] sm:$0xff] }
 0x118   : > { %v1170_v49 = vsel %vm849_vm0, %v1168_v40, %v5175_v18  ;;  %v5173_v44 = vrot.slane %v4604_v0, 2  ;;  %v4621_v11 = vmul.f32 %v4609_v16, %v4092_v39  ;;  %v1898_v27 = vrot.slane %v1772_v26, 2 }
 0x119   : > { %v2272_v19 = vadd.f32 %v3949_v36, %v2236_v51  ;;  %v1235_v8 = vadd.f32 %v1170_v49, %v992_v10  ;;  %v4630_v59 = vmul.f32 0.0, %v4627_v25  ;;  %v558_v13 = vmul.f32 %v2791_v45, %v4531_v48  ;;  %v4650_v10 = vld [vmem:[%s2917_s20 + $0x38] sm:$0xff] }
 0x11a   : > { %v1657_v54 = vsel %vm1579_vm1, %v1655_v14, %v5173_v44  ;;  %v5174_v55 = vrot.slane %v4621_v11, 2  ;;  %v625_v35 = vmul.f32 %v4538_v9, %v5355_v31  ;;  %v692_v30 = vmul.f32 %v2792_v2, %v4550_v60 }
 0x11b   : > { %5354 = vst [vmem:[#allocation2_spill] sm:$0xff] %v4630_v59  ;;  %v2304_v4 = vmax.f32 %v2272_v19, 0.0  ;;  %v1478_v40 = vadd.f32 %v5172_v63, %v1235_v8  ;;  %v5179_v20 = vrot.slane %v4630_v59, 2  ;;  %v762_v43 = vmul.f32 %v2791_v45, %v4558_v23 }
 0x11c   : > { %v1900_v26 = vsel %vm1579_vm1, %v1898_v27, %v5174_v55  ;;  %v657_v51 = vadd.f32 %v625_v35, %v558_v13  ;;  %v4654_v14 = vmul.f32 %v4650_v10, %v4558_v23  ;;  %v1006_v49 = vmul.f32 %v4574_v46, %v5355_v31  ;;  %v4665_v55 = vld [vmem:[%s2917_s20 + $0x68] sm:$0xff] }
 0x11d   : > { %2416 = vmatmul.f32.gmra.mxu2 %v2304_v4  ;;  %v1722_v19 = vadd.f32 %v1657_v54, %v1478_v40  ;;  %v865_v8 = vrot.slane %v762_v43, 1  ;;  %v4660_v63 = vmul.f32 %v4574_v46, %v4187_v47  ;;  %v1249_v44 = vmul.f32 %v2792_v2, %v4587_v22 }
 0x11e   : > { %v724_v27 = vadd.f32 %v692_v30, %v657_v51  ;;  %v5177_v13 = vrot.slane %v4654_v14, 1  ;;  %v1108_v35 = vrot.slane %v1006_v49, 1  ;;  %v4669_v18 = vmul.f32 %v4665_v55, %v4587_v22 }
 0x11f   : > { %v1965_v41 = vadd.f32 %v1900_v26, %v1722_v19  ;;  %v5181_v54 = vrot.slane %v4660_v63, 1  ;;  %v1351_v4 = vrot.slane %v1249_v44, 1  ;;  %v1492_v40 = vmul.f32 %v2791_v45, %v4595_v62 }
 0x120   : > { %v867_v43 = vsel %vm849_vm0, %v865_v8, %v5177_v13  ;;  %v5180_v30 = vrot.slane %v4669_v18, 1  ;;  %v4679_v51 = vmul.f32 %v4650_v10, %v4595_v62  ;;  %v1736_v49 = vmul.f32 %v4609_v16, %v5355_v31 }
 0x121   : > { %v2208_v26 = vadd.f32 %v5179_v20, %v1965_v41  ;;  %v968_v44 = vadd.f32 %v867_v43, %v724_v27  ;;  %v1110_v45 = vsel %vm849_vm0, %v1108_v35, %v5181_v54  ;;  %v1595_v19 = vrot.slane %v1492_v40, 2  ;;  %v2795_v20 = vld [vmem:[%s2917_s20 + $0x90] sm:$0xff] }
 0x122   : > { %v1353_v8 = vsel %vm849_vm0, %v1351_v4, %v5180_v30  ;;  %v5182_v13 = vrot.slane %v4679_v51, 2  ;;  %v4694_v33 = vmul.f32 %v4609_v16, %v4187_v47  ;;  %v1838_v31 = vrot.slane %v1736_v49, 2  ;;  %v5356_v30 = vld [vmem:[#allocation7_spill] sm:$0xff] }
 0x123   : > { %v2244_v41 = vmul.f32 %v3941_v37, %v2208_v26  ;;  %v1211_v27 = vadd.f32 %v1110_v45, %v968_v44  ;;  %v1979_v43 = vmul.f32 %v2792_v2, %v4627_v25  ;;  %v4700_v35 = vmul.f32 %v4665_v55, %v4627_v25 }
 0x124   : > { %v1597_v4 = vsel %vm1579_vm1, %v1595_v19, %v5182_v13  ;;  %v5188_v40 = vrot.slane %v4694_v33, 2  ;;  %v566_v49 = vmul.f32 %v2795_v20, %v4531_v48  ;;  %v633_v37 = vmul.f32 %v4538_v9, %v5356_v30  ;;  %v2796_v13 = vld [vmem:[%s2917_s20 + $0xc0] sm:$0xff] }
 0x125   : > { %v2280_v26 = vadd.f32 %v3949_v36, %v2244_v41  ;;  %v1454_v2 = vadd.f32 %v1353_v8, %v1211_v27  ;;  %v2081_v44 = vrot.slane %v1979_v43, 2  ;;  %v5187_v45 = vrot.slane %v4700_v35, 2  ;;  %v4722_v8 = vld [vmem:[%s2917_s20 + $0x98] sm:$0xff] }
 0x126   : > { %v1840_v54 = vsel %vm1579_vm1, %v1838_v31, %v5188_v40  ;;  %v665_v19 = vadd.f32 %v633_v37, %v566_v49  ;;  %v700_v53 = vmul.f32 %v2796_v13, %v4550_v60  ;;  %v774_v17 = vmul.f32 %v2795_v20, %v4558_v23 }
 0x127   : > { %v2312_v57 = vmax.f32 %v2280_v26, 0.0  ;;  %v1698_v38 = vadd.f32 %v1597_v4, %v1454_v2  ;;  %v2083_v36 = vsel %vm1579_vm1, %v2081_v44, %v5187_v45  ;;  %v4726_v41 = vmul.f32 %v4722_v8, %v4558_v23  ;;  %v4737_v2 = vld [vmem:[%s2917_s20 + $0xc8] sm:$0xff] }
 0x128   : > { %v732_v31 = vadd.f32 %v700_v53, %v665_v19  ;;  %v885_v27 = vrot.slane %v774_v17, 1  ;;  %v1018_v43 = vmul.f32 %v4574_v46, %v5356_v30  ;;  %v4732_v49 = vmul.f32 %v4574_v46, %v4262_v58 }
 0x129   : > { %5357 = vst [vmem:[#allocation4_spill] sm:$0xff] %v4726_v41  ;;  %2440 = vmatmul.f32.gmra.mxu3 %v2312_v57  ;;  %v1941_v4 = vadd.f32 %v1840_v54, %v1698_v38  ;;  %v5196_v37 = vrot.slane %v4726_v41, 1  ;;  %v1261_v26 = vmul.f32 %v2796_v13, %v4587_v22  ;;  %v4741_v44 = vmul.f32 %v4737_v2, %v4587_v22 }
 0x12a   : > { %5358 = vst [vmem:[#allocation6_spill] sm:$0xff] %v4732_v49  ;;  %v1128_v17 = vrot.slane %v1018_v43, 1  ;;  %v5195_v53 = vrot.slane %v4732_v49, 1  ;;  %v1504_v19 = vmul.f32 %v2795_v20, %v4595_v62  ;;  %v4747_v45 = vmul.f32 %v4722_v8, %v4595_v62 }
 0x12b   : > { %5359 = vst [vmem:[#allocation11_spill] sm:$0xff] %v4741_v44  ;;  %v2184_v38 = vadd.f32 %v2083_v36, %v1941_v4  ;;  %v887_v57 = vsel %vm849_vm0, %v885_v27, %v5196_v37  ;;  %v1371_v54 = vrot.slane %v1261_v26, 1  ;;  %v5194_v40 = vrot.slane %v4741_v44, 1 }
 0x12c   : > { %5360 = vst [vmem:[#allocation12_spill] sm:$0xff] %v4747_v45  ;;  %v976_v32 = vadd.f32 %v887_v57, %v732_v31  ;;  %v1130_v43 = vsel %vm849_vm0, %v1128_v17, %v5195_v53  ;;  %v1615_v59 = vrot.slane %v1504_v19, 2  ;;  %v5193_v20 = vrot.slane %v4747_v45, 2  ;;  %v2802_v45 = vld [vmem:[%s2917_s20 + $0x100] sm:$0x3] }
 0x12d   : > { %v2220_v36 = vmul.f32 %v4760_v50, %v2184_v38  ;;  %v1373_v27 = vsel %vm849_vm0, %v1371_v54, %v5194_v40  ;;  %v1748_v31 = vmul.f32 %v4609_v16, %v5356_v30  ;;  %v4770_v4 = vmul.f32 %v4609_v16, %v4262_v58  ;;  %v4783_v30 = vld [vmem:[%s5035_s5] ss:$0 sm:$0xff] }
 0x12e   : > { %v1219_v26 = vadd.f32 %v1130_v43, %v976_v32  ;;  %v1617_v17 = vsel %vm1579_vm1, %v1615_v59, %v5193_v20  ;;  %v1991_v19 = vmul.f32 %v2796_v13, %v4627_v25  ;;  %v4778_v38 = vmul.f32 %v4737_v2, %v4627_v25 }
 0x12f   : > { %5361 = vst [vmem:[#allocation8_spill] sm:$0xff] %v4770_v4  ;;  %v2256_v57 = vadd.f32 %v4783_v30, %v2220_v36  ;;  %v1858_v54 = vrot.slane %v1748_v31, 2  ;;  %v5199_v32 = vrot.slane %v4770_v4, 2  ;;  %v575_v59 = vmul.f32 %v4531_v48, %v4475_v56  ;;  %v2801_v36 = vld [vmem:[%s2917_s20 + $0x128] sm:$0xff] }
 0x130   : > { %5362 = vst [vmem:[#allocation16_spill] sm:$0xff] %v4778_v38  ;;  %v1462_v43 = vadd.f32 %v1373_v27, %v1219_v26  ;;  %v2101_v13 = vrot.slane %v1991_v19, 2  ;;  %v5202_v20 = vrot.slane %v4778_v38, 2  ;;  %v642_v40 = vmul.f32 %v4538_v9, %v5351_v42 }
 0x131   : > { %v2288_v53 = vmax.f32 %v2256_v57, 0.0  ;;  %v1860_v37 = vsel %vm1579_vm1, %v1858_v54, %v5199_v32  ;;  %v709_v31 = vmul.f32 %v2801_v36, %v4550_v60  ;;  %v788_v44 = vmul.f32 %v2802_v45, %v4558_v23  ;;  %v2803_v57 = vld [vmem:[%s2917_s20 + $0x130] sm:$0x3] }
 0x132   : > { %v1706_v56 = vadd.f32 %v1617_v17, %v1462_v43  ;;  %v2103_v27 = vsel %vm1579_vm1, %v2101_v13, %v5202_v20  ;;  %v674_v26 = vadd.f32 %v642_v40, %v575_v59  ;;  %v1032_v42 = vmul.f32 %v4574_v46, %v4320_v6 }
 0x133   : > { %2368 = vmatmul.f32.gmra.mxu0 %v2288_v53  ;;  %v908_v19 = vrot.slane %v788_v44, 1  ;;  %v1275_v54 = vmul.f32 %v2803_v57, %v4587_v22  ;;  %v1518_v32 = vmul.f32 %v2802_v45, %v4595_v62  ;;  %v1762_v36 = vmul.f32 %v4609_v16, %v4320_v6 }
 0x134   : > { %v1949_v4 = vadd.f32 %v1860_v37, %v1706_v56  ;;  %v741_v17 = vadd.f32 %v709_v31, %v674_v26  ;;  %v1151_v43 = vrot.slane %v1032_v42, 1  ;;  %v2005_v38 = vmul.f32 %v2803_v57, %v4627_v25 }
 0x135   : > { %v5363_v40 = vrot.slane %v4479_v24, 1  ;;  %v1394_v53 = vrot.slane %v1275_v54, 1  ;;  %v1638_v44 = vrot.slane %v1518_v32, 2  ;;  %v1881_v13 = vrot.slane %v1762_v36, 2 }
 0x136   : > { %v2192_v20 = vadd.f32 %v2103_v27, %v1949_v4  ;;  %v5364_v45 = vrot.slane %v4487_v5, 1  ;;  %v2124_v6 = vrot.slane %v2005_v38, 2  ;;  %v5365_v37 = vrot.slane %v4497_v29, 1 }
 0x137   : > { %v909_v59 = vsel %vm849_vm0, %v5363_v40, %v908_v19  ;;  %v5366_v56 = vrot.slane %v4506_v7, 2  ;;  %v5367_v26 = vrot.slane %v4512_v61, 2  ;;  %v583_v4 = vmul.f32 %v4562_v34, %v4531_v48  ;;  %v2804_v7 = vld [vmem:[%s2917_s20 + $0x160] sm:$0x3] }
 0x138   : > { %v985_v49 = vadd.f32 %v909_v59, %v741_v17  ;;  %v1152_v41 = vsel %vm849_vm0, %v5364_v45, %v1151_v43  ;;  %v1395_v31 = vsel %vm849_vm0, %v5365_v37, %v1394_v53  ;;  %v2228_v5 = vmul.f32 %v4760_v50, %v2192_v20 }
 0x139   : > { %v1639_v24 = vsel %vm1579_vm1, %v5366_v56, %v1638_v44  ;;  %v1882_v32 = vsel %vm1579_vm1, %v5367_v26, %v1881_v13  ;;  %v5368_v38 = vrot.slane %v4523_v21, 2  ;;  %v650_v42 = vmul.f32 %v4538_v9, %v4092_v39  ;;  %v4864_v26 = vpop.f32.mrf.mxu2 }
 0x13a   : > { %v1228_v27 = vadd.f32 %v1152_v41, %v985_v49  ;;  %v800_v19 = vmul.f32 %v2804_v7, %v4558_v23  ;;  %v1044_v61 = vmul.f32 %v4574_v46, %v4342_v12  ;;  %v1530_v57 = vmul.f32 %v2804_v7, %v4595_v62 }
 0x13b   : > { %v2125_v29 = vsel %vm1579_vm1, %v5368_v38, %v2124_v6  ;;  %v1774_v34 = vmul.f32 %v4609_v16, %v4342_v12  ;;  %v2264_v41 = vadd.f32 %v4783_v30, %v2228_v5  ;;  %v682_v21 = vadd.f32 %v650_v42, %v583_v4  ;;  %v2805_v4 = vld [vmem:[%s2917_s20 + $0x40] sm:$0x3] }
 0x13c   : > { %v1471_v49 = vadd.f32 %v1395_v31, %v1228_v27  ;;  %v559_v20 = vmul.f32 %v4650_v10, %v4531_v48  ;;  %v928_v54 = vrot.slane %v800_v19, 1  ;;  %v1171_v39 = vrot.slane %v1044_v61, 1  ;;  %v4858_v31 = vpop.f32.mrf.mxu0  ;;  %v2806_v27 = vld [vmem:[%s2917_s20 + $0x70] sm:$0x3] }
 0x13d   : > { %v1658_v36 = vrot.slane %v1530_v57, 2  ;;  %v1901_v17 = vrot.slane %v1774_v34, 2  ;;  %v2296_v43 = vmax.f32 %v2264_v41, 0.0  ;;  %v749_v59 = vadd.f32 %v4553_v3, %v682_v21 }
 0x13e   : > { %v1715_v40 = vadd.f32 %v1639_v24, %v1471_v49  ;;  %v626_v53 = vmul.f32 %v4538_v9, %v4187_v47  ;;  %v5369_v12 = vrot.slane %v4566_v28, 1  ;;  %v5370_v13 = vrot.slane %v4582_v1, 1  ;;  %v4860_v47 = vpop.f32.mrf.mxu1 }
 0x13f   : > { %v5371_v45 = vrot.slane %v4604_v0, 2  ;;  %v5372_v37 = vrot.slane %v4621_v11, 2  ;;  %2392 = vmatmul.f32.gmra.mxu1 %v2296_v43  ;;  %v693_v1 = vmul.f32 %v4665_v55, %v4550_v60  ;;  %v4866_v0 = vpop.f32.mrf.mxu3  ;;  %v764_v11 = vmul.f32 %v2805_v4, %v4558_v23 }
 0x140   : > { %v929_v44 = vsel %vm849_vm0, %v5369_v12, %v928_v54  ;;  %v1172_v10 = vsel %vm849_vm0, %v5370_v13, %v1171_v39  ;;  %v1958_v28 = vadd.f32 %v1882_v32, %v1715_v40  ;;  %v658_v24 = vadd.f32 %v626_v53, %v559_v20 }
 0x141   : > { %v1659_v6 = vsel %vm1579_vm1, %v5371_v45, %v1658_v36  ;;  %v1902_v3 = vsel %vm1579_vm1, %v5372_v37, %v1901_v17  ;;  %v993_v56 = vadd.f32 %v929_v44, %v749_v59  ;;  %v1008_v5 = vmul.f32 %v4574_v46, %v4395_v52 }
 0x142   : > { %v1251_v38 = vmul.f32 %v2806_v27, %v4587_v22  ;;  %v1494_v32 = vmul.f32 %v2805_v4, %v4595_v62  ;;  %v2201_v42 = vadd.f32 %v2125_v29, %v1958_v28  ;;  %v725_v19 = vadd.f32 %v693_v1, %v658_v24  ;;  %v2807_v24 = vld [vmem:[%s2917_s20 + $0xa0] sm:$0x3]  ;;  %v2402_v1 = vpop.f32.mrf.mxu2 }
 0x143   : > { %v1236_v7 = vadd.f32 %v1172_v10, %v993_v56  ;;  %v1738_v55 = vmul.f32 %v4609_v16, %v4395_v52  ;;  %v868_v61 = vrot.slane %v764_v11, 1  ;;  %v1111_v57 = vrot.slane %v1008_v5, 1  ;;  %v5380_v5 = vld [vmem:[#allocation14_spill] sm:$0xff] }
 0x144   : > { %v1354_v34 = vrot.slane %v1251_v38, 1  ;;  %v1598_v41 = vrot.slane %v1494_v32, 2  ;;  %v2237_v49 = vmul.f32 %v4760_v50, %v2201_v42  ;;  %v5373_v21 = vrot.slane %v4590_v15, 1  ;;  %v2354_v45 = vpop.f32.mrf.mxu0 }
 0x145   : > { %v1841_v54 = vrot.slane %v1738_v55, 2  ;;  %v1981_v39 = vmul.f32 %v2806_v27, %v4627_v25  ;;  %v5374_v36 = vrot.slane %v4654_v14, 1  ;;  %v5375_v17 = vrot.slane %v4660_v63, 1 }
 0x146   : > { %v1479_v20 = vadd.f32 %v5373_v21, %v1236_v7  ;;  %v5376_v43 = vrot.slane %v4669_v18, 1  ;;  %v5377_v59 = vrot.slane %v4679_v51, 2  ;;  %v2273_v53 = vadd.f32 %v4783_v30, %v2237_v49  ;;  %v2378_v37 = vpop.f32.mrf.mxu1  ;;  %v5385_v49 = vld [vmem:[#allocation6_spill] sm:$0xff] }
 0x147   : > { %v869_v29 = vsel %vm849_vm0, %v5374_v36, %v868_v61  ;;  %v1112_v52 = vsel %vm849_vm0, %v5375_v17, %v1111_v57  ;;  %v5378_v14 = vrot.slane %v4694_v33, 2  ;;  %v2084_v63 = vrot.slane %v1981_v39, 2  ;;  %v2426_v4 = vpop.f32.mrf.mxu3  ;;  %v5383_v61 = vld [vmem:[#allocation4_spill] sm:$0xff] }
 0x148   : > { %v1355_v40 = vsel %vm849_vm0, %v5376_v43, %v1354_v34  ;;  %v1599_v15 = vsel %vm1579_vm1, %v5377_v59, %v1598_v41  ;;  %v1723_v12 = vadd.f32 %v1659_v6, %v1479_v20  ;;  %v969_v44 = vadd.f32 %v869_v29, %v725_v19 }
 0x149   : > { %v1842_v13 = vsel %vm1579_vm1, %v5378_v14, %v1841_v54  ;;  %v567_v18 = vmul.f32 %v4722_v8, %v4531_v48  ;;  %v634_v10 = vmul.f32 %v4538_v9, %v4262_v58  ;;  %v701_v51 = vmul.f32 %v4737_v2, %v4550_v60  ;;  %v2808_v9 = vld [vmem:[%s2917_s20 + $0xd0] sm:$0x3]  ;;  %v5381_v2 = vld [vmem:[#allocation2_spill] sm:$0xff]  ;;  %v5387_v54 = vld [vmem:[#allocation11_spill] sm:$0xff]  ;;  %s2657_s20 = sshll.u32 %s5400_s26, 8 }
 0x14a   : > { %v2305_v28 = vmax.f32 %v2273_v53, 0.0  ;;  %v1966_v6 = vadd.f32 %v1902_v3, %v1723_v12  ;;  %v1212_v56 = vadd.f32 %v1112_v52, %v969_v44  ;;  %v776_v33 = vmul.f32 %v2807_v24, %v4558_v23  ;;  %v5389_v52 = vld [vmem:[#allocation12_spill] sm:$0xff]  ;;  %s4948_s16 = scalar_lea.vmem %s5038_s8, %s2657_s20 }
 0x14b   : > { %v5379_v11 = vrot.slane %v4700_v35, 2  ;;  %v666_v8 = vadd.f32 %v634_v10, %v567_v18  ;;  %v1020_v58 = vmul.f32 %v4574_v46, %v5380_v5  ;;  %v1263_v60 = vmul.f32 %v2808_v9, %v4587_v22  ;;  %v4920_v46 = vld [vmem:[%s5037_s7] ss:$0 sm:$0xff]  ;;  %v5391_v53 = vld [vmem:[#allocation8_spill] sm:$0xff] }
 0x14c   : > { %2419 = vmatmul.f32.gmra.mxu2 %v2305_v28  ;;  %v5382_v3 = vrot.slane %v5381_v2, 2  ;;  %v1455_v38 = vadd.f32 %v1355_v40, %v1212_v56  ;;  %v888_v23 = vrot.slane %v776_v33, 1  ;;  %v1506_v32 = vmul.f32 %v2807_v24, %v4595_v62  ;;  %v2357_v18 = vpop.f32.mrf.mxu0 }
 0x14d   : > { %v2085_v48 = vsel %vm1579_vm1, %v5379_v11, %v2084_v63  ;;  %v733_v42 = vadd.f32 %v701_v51, %v666_v8  ;;  %v1131_v35 = vrot.slane %v1020_v58, 1  ;;  %v1374_v7 = vrot.slane %v1263_v60, 1 }
 0x14e   : > { %v2209_v27 = vadd.f32 %v5382_v3, %v1966_v6  ;;  %v1750_v19 = vmul.f32 %v4609_v16, %v5380_v5  ;;  %v1699_v55 = vadd.f32 %v1599_v15, %v1455_v38  ;;  %v5384_v57 = vrot.slane %v5383_v61, 1  ;;  %v2381_v10 = vpop.f32.mrf.mxu1  ;;  %v2405_v6 = vpop.f32.mrf.mxu2 }
 0x14f   : > { %v1618_v41 = vrot.slane %v1506_v32, 2  ;;  %v5386_v21 = vrot.slane %v5385_v49, 1  ;;  %v5388_v16 = vrot.slane %v5387_v54, 1  ;;  %v5390_v43 = vrot.slane %v5389_v52, 2  ;;  %v2429_v56 = vpop.f32.mrf.mxu3 }
 0x150   : > { %v2245_v22 = vmul.f32 %v4760_v50, %v2209_v27  ;;  %v889_v34 = vsel %vm849_vm0, %v5384_v57, %v888_v23  ;;  %v1861_v36 = vrot.slane %v1750_v19, 2  ;;  %v1942_v17 = vadd.f32 %v1842_v13, %v1699_v55 }
 0x151   : > { %v977_v62 = vadd.f32 %v889_v34, %v733_v42  ;;  %v1132_v20 = vsel %vm849_vm0, %v5386_v21, %v1131_v35  ;;  %v1375_v39 = vsel %vm849_vm0, %v5388_v16, %v1374_v7  ;;  %v1619_v40 = vsel %vm1579_vm1, %v5390_v43, %v1618_v41 }
 0x152   : > { %v2281_v29 = vadd.f32 %v4783_v30, %v2245_v22  ;;  %v1993_v59 = vmul.f32 %v2808_v9, %v4627_v25  ;;  %v5392_v12 = vrot.slane %v5391_v53, 2  ;;  %v2352_v14 = vadd.f32 %v4920_v46, %v4858_v31 }
 0x153   : > { %v1220_v15 = vadd.f32 %v1132_v20, %v977_v62  ;;  %v2376_v63 = vadd.f32 %v4920_v46, %v4860_v47  ;;  %v2185_v51 = vadd.f32 %v2085_v48, %v1942_v17  ;;  %v2400_v25 = vadd.f32 %v4920_v46, %v4864_v26  ;;  %v5393_v48 = vld [vmem:[#allocation16_spill] sm:$0xff] }
 0x154   : > { %v1862_v44 = vsel %vm1579_vm1, %v5392_v12, %v1861_v36  ;;  %v2313_v13 = vmax.f32 %v2281_v29, 0.0  ;;  %v2104_v28 = vrot.slane %v1993_v59, 2  ;;  %v2447_v24 = vmax.f32 %v2352_v14, 0.0  ;;  %v2360_v55 = vpop.f32.mrf.mxu0 }
 0x155   : > { %v1463_v31 = vadd.f32 %v1375_v39, %v1220_v15  ;;  %v2455_v47 = vmax.f32 %v2376_v63, 0.0  ;;  %v2424_v33 = vadd.f32 %v4920_v46, %v4866_v0  ;;  %v2221_v11 = vmul.f32 %v4760_v50, %v2185_v51 }
 0x156   : > { %2443 = vmatmul.f32.gmra.mxu3 %v2313_v13  ;;  %v5394_v8 = vrot.slane %v5393_v48, 2  ;;  %v2463_v58 = vmax.f32 %v2400_v25, 0.0  ;;  %v2355_v26 = vadd.f32 %v4920_v46, %v2354_v45  ;;  %2479 = vst [vmem:[%s4948_s16] sm:$0xff] %v2447_v24  ;;  %v2379_v2 = vadd.f32 %v4920_v46, %v2378_v37  ;;  %v2384_v61 = vpop.f32.mrf.mxu1  ;;  %v2408_v62 = vpop.f32.mrf.mxu2 }
 0x157   : > { %v1707_v9 = vadd.f32 %v1619_v40, %v1463_v31  ;;  %v2471_v60 = vmax.f32 %v2424_v33, 0.0  ;;  %v2403_v3 = vadd.f32 %v4920_v46, %v2402_v1  ;;  %v2257_v0 = vadd.f32 %v4783_v30, %v2221_v11  ;;  %2487 = vst [vmem:[%s4948_s16 + $0x40] sm:$0xff] %v2455_v47  ;;  %v2432_v49 = vpop.f32.mrf.mxu3 }
 0x158   : > { %v2105_v5 = vsel %vm1579_vm1, %v5394_v8, %v2104_v28  ;;  %v2448_v27 = vmax.f32 %v2355_v26, 0.0  ;;  %v2427_v38 = vadd.f32 %v4920_v46, %v2426_v4  ;;  %v2358_v23 = vadd.f32 %v4920_v46, %v2357_v18  ;;  %2495 = vst [vmem:[%s4948_s16 + $0x80] sm:$0xff] %v2463_v58 }
 0x159   : > { %v1950_v32 = vadd.f32 %v1862_v44, %v1707_v9  ;;  %v2456_v45 = vmax.f32 %v2379_v2, 0.0  ;;  %v2464_v42 = vmax.f32 %v2403_v3, 0.0  ;;  %v2382_v35 = vadd.f32 %v4920_v46, %v2381_v10  ;;  %2503 = vst [vmem:[%s4948_s16 + $0xc0] sm:$0xff] %v2471_v60 }
 0x15a   : > { %v2289_v7 = vmax.f32 %v2257_v0, 0.0  ;;  %v2472_v37 = vmax.f32 %v2427_v38, 0.0  ;;  %v2406_v1 = vadd.f32 %v4920_v46, %v2405_v6  ;;  %2480 = vst [vmem:[%s4948_s16 + $0x8] sm:$0xff] %v2448_v27  ;;  %v2449_v22 = vmax.f32 %v2358_v23, 0.0 }
 0x15b   : > { %v2193_v19 = vadd.f32 %v2105_v5, %v1950_v32  ;;  %v2430_v4 = vadd.f32 %v4920_v46, %v2429_v56  ;;  %2488 = vst [vmem:[%s4948_s16 + $0x48] sm:$0xff] %v2456_v45  ;;  %v2457_v57 = vmax.f32 %v2382_v35, 0.0  ;;  %v2361_v34 = vadd.f32 %v4920_v46, %v2360_v55 }
 0x15c   : > { %2371 = vmatmul.f32.gmra.mxu0 %v2289_v7  ;;  %v2385_v41 = vadd.f32 %v4920_v46, %v2384_v61  ;;  %2496 = vst [vmem:[%s4948_s16 + $0x88] sm:$0xff] %v2464_v42  ;;  %v2465_v20 = vmax.f32 %v2406_v1, 0.0  ;;  %v2409_v54 = vadd.f32 %v4920_v46, %v2408_v62  ;;  %v2433_v39 = vadd.f32 %v4920_v46, %v2432_v49 }
 0x15d   : > { %v2229_v21 = vmul.f32 %v4760_v50, %v2193_v19  ;;  %2504 = vst [vmem:[%s4948_s16 + $0xc8] sm:$0xff] %v2472_v37  ;;  %v2473_v16 = vmax.f32 %v2430_v4, 0.0  ;;  %v2450_v29 = vmax.f32 %v2361_v34, 0.0 }
 0x15e   : > { %2481 = vst [vmem:[%s4948_s16 + $0x10] sm:$0xff] %v2449_v22  ;;  %v2458_v17 = vmax.f32 %v2385_v41, 0.0  ;;  %v2466_v52 = vmax.f32 %v2409_v54, 0.0  ;;  %v2474_v43 = vmax.f32 %v2433_v39, 0.0  ;;  %v2411_v40 = vpop.f32.mrf.mxu2 }
 0x15f   : > { %v2265_v36 = vadd.f32 %v4783_v30, %v2229_v21  ;;  %2489 = vst [vmem:[%s4948_s16 + $0x50] sm:$0xff] %v2457_v57  ;;  %v2412_v30 = vadd.f32 %v4920_v46, %v2411_v40  ;;  %v2435_v59 = vpop.f32.mrf.mxu3  ;;  %v2363_v44 = vpop.f32.mrf.mxu0 }
 0x160   : > { %2497 = vst [vmem:[%s4948_s16 + $0x90] sm:$0xff] %v2465_v20  ;;  %v2436_v53 = vadd.f32 %v4920_v46, %v2435_v59  ;;  %v2364_v14 = vadd.f32 %v4920_v46, %v2363_v44 }
 0x161   : > { %v2297_v50 = vmax.f32 %v2265_v36, 0.0  ;;  %2505 = vst [vmem:[%s4948_s16 + $0xd0] sm:$0xff] %v2473_v16  ;;  %v2467_v15 = vmax.f32 %v2412_v30, 0.0 }
 0x162   : > { %2482 = vst [vmem:[%s4948_s16 + $0x18] sm:$0xff] %v2450_v29  ;;  %v2475_v12 = vmax.f32 %v2436_v53, 0.0  ;;  %v2451_v63 = vmax.f32 %v2364_v14, 0.0 }
 0x163   : > { %2395 = vmatmul.f32.gmra.mxu1 %v2297_v50  ;;  %2490 = vst [vmem:[%s4948_s16 + $0x58] sm:$0xff] %v2458_v17 }
 0x164   : > { %2498 = vst [vmem:[%s4948_s16 + $0x98] sm:$0xff] %v2466_v52 }
 0x165   : > { %2506 = vst [vmem:[%s4948_s16 + $0xd8] sm:$0xff] %v2474_v43 }
 0x166   : > { %2499 = vst [vmem:[%s4948_s16 + $0xa0] sm:$0xff] %v2467_v15 }
 0x167   : > { %2507 = vst [vmem:[%s4948_s16 + $0xe0] sm:$0xff] %v2475_v12 }
 0x168   : > { %2483 = vst [vmem:[%s4948_s16 + $0x20] sm:$0xff] %v2451_v63 }
 0x16b   : > { %v2387_v18 = vpop.f32.mrf.mxu1 }
 0x16c   : > { %v2388_v10 = vadd.f32 %v4920_v46, %v2387_v18 }
 0x16e   : > { %v2459_v13 = vmax.f32 %v2388_v10, 0.0 }
 0x170   : > { %2491 = vst [vmem:[%s4948_s16 + $0x60] sm:$0xff] %v2459_v13 }
 0x17e   : > { %v2414_v51 = vpop.f32.mrf.mxu2 }
 0x17f   : > { %v2415_v28 = vadd.f32 %v4920_v46, %v2414_v51 }
 0x181   : > { %v2468_v25 = vmax.f32 %v2415_v28, 0.0 }
 0x183   : > { %2500 = vst [vmem:[%s4948_s16 + $0xa8] sm:$0xff] %v2468_v25 }
 0x186   : > { %v2438_v6 = vpop.f32.mrf.mxu3 }
 0x187   : > { %v2439_v56 = vadd.f32 %v4920_v46, %v2438_v6 }
 0x189   : > { %v2476_v47 = vmax.f32 %v2439_v56, 0.0 }
 0x18a   : > { %v2366_v31 = vpop.f32.mrf.mxu0 }
 0x18b   : > { %v2367_v24 = vadd.f32 %v4920_v46, %v2366_v31  ;;  %2508 = vst [vmem:[%s4948_s16 + $0xe8] sm:$0xff] %v2476_v47 }
 0x18d   : > { %v2452_v33 = vmax.f32 %v2367_v24, 0.0 }
 0x18f   : > { %2484 = vst [vmem:[%s4948_s16 + $0x28] sm:$0xff] %v2452_v33 }
 0x192   : > { %v2390_v11 = vpop.f32.mrf.mxu1 }
 0x193   : > { %v2391_v48 = vadd.f32 %v4920_v46, %v2390_v11 }
 0x195   : > { %v2460_v8 = vmax.f32 %v2391_v48, 0.0 }
 0x197   : > { %2492 = vst [vmem:[%s4948_s16 + $0x68] sm:$0xff] %v2460_v8 }
 0x1a0   : > { %v2417_v5 = vpop.f32.mrf.mxu2 }
 0x1a1   : > { %v2418_v58 = vadd.f32 %v4920_v46, %v2417_v5 }
 0x1a3   : > { %v2469_v26 = vmax.f32 %v2418_v58, 0.0 }
 0x1a5   : > { %2501 = vst [vmem:[%s4948_s16 + $0xb0] sm:$0xff] %v2469_v26 }
 0x1ac   : > { %v2441_v9 = vpop.f32.mrf.mxu3 }
 0x1ad   : > { %v2442_v60 = vadd.f32 %v4920_v46, %v2441_v9 }
 0x1af   : > { %v2477_v2 = vmax.f32 %v2442_v60, 0.0 }
 0x1b0   : > { %v2369_v3 = vpop.f32.mrf.mxu0 }
 0x1b1   : > { %v2370_v0 = vadd.f32 %v4920_v46, %v2369_v3  ;;  %2509 = vst [vmem:[%s4948_s16 + $0xf0] sm:$0xff] %v2477_v2 }
 0x1b3   : > { %v2453_v27 = vmax.f32 %v2370_v0, 0.0 }
 0x1b5   : > { %2485 = vst [vmem:[%s4948_s16 + $0x30] sm:$0xff] %v2453_v27 }
 0x1bc   : > { %v2393_v38 = vpop.f32.mrf.mxu1 }
 0x1bd   : > { %v2394_v23 = vadd.f32 %v4920_v46, %v2393_v38 }
 0x1bf   : > { %v2461_v32 = vmax.f32 %v2394_v23, 0.0 }
 0x1c1   : > { %2493 = vst [vmem:[%s4948_s16 + $0x70] sm:$0xff] %v2461_v32 }
 0x1cf   : > { %v2420_v45 = vpop.f32.mrf.mxu2 }
 0x1d0   : > { %v2421_v42 = vadd.f32 %v4920_v46, %v2420_v45 }
 0x1d2   : > { %v2470_v35 = vmax.f32 %v2421_v42, 0.0 }
 0x1d4   : > { %2502 = vst [vmem:[%s4948_s16 + $0xb8] sm:$0xff] %v2470_v35 }
 0x1d9   : > { %v2372_v7 = vpop.f32.mrf.mxu0  ;;  %v2444_v37 = vpop.f32.mrf.mxu3 }
 0x1da   : > { %v2373_v1 = vadd.f32 %v4920_v46, %v2372_v7  ;;  %v2445_v19 = vadd.f32 %v4920_v46, %v2444_v37 }
 0x1dc   : > { %v2454_v22 = vmax.f32 %v2373_v1, 0.0  ;;  %v2478_v4 = vmax.f32 %v2445_v19, 0.0 }
 0x1de   : > { %2486 = vst [vmem:[%s4948_s16 + $0x38] sm:$0xff] %v2454_v22 }
 0x1df   : > { %2510 = vst [vmem:[%s4948_s16 + $0xf8] sm:$0xff] %v2478_v4 }
 0x1e0   : > { %v2396_v55 = vpop.f32.mrf.mxu1 }
 0x1e1   : > { %v2397_v61 = vadd.f32 %v4920_v46, %v2396_v55 }
 0x1e3   : > { %v2462_v57 = vmax.f32 %v2397_v61, 0.0 }
 0x1e5   : > { %2494 = vst [vmem:[%s4948_s16 + $0x78] sm:$0xff] %v2462_v57 }
 0x1e6 PF: > { %s18_s27 = sadd.s32 1, %s2831_s27   ;;  %s5395_s26 = smov %s2827_s2 }
 0x1e7   : > { %p15_p5 = scmp.ge.s32.totalorder %s18_s27, 4   ;;  %s5396_s2 = smov %s5398_s28 }
 0x1e9   :  { %17 = sbr.rel (!%p15_p5) target bundleno = 2 (0x2), region = 88 }

</bundles_post_ra>
